<compile_context>
chip_gen: v7x
topology: tpu7x:2x2x1
jax: 0.10.0
libtpu: 0.0.40
codegen_flags: <defaults>
</compile_context>

<pallas_src>
import functools

import jax
import jax.numpy as jnp
import numpy as np
from jax.experimental import pallas as pl
from jax.experimental.pallas import tpu as pltpu


# ----------------------------------------------------------------------------
# Pallas kernel: one grid step == one chunk of `chunk` timesteps, both directions.
# ----------------------------------------------------------------------------
def _bilstm_chunk_kernel(
    gxf_ref,      # (chunk, Bp, 4H) f32   precomputed x-gates, forward time order
    gxb_ref,      # (chunk, Bp, 4H) f32   precomputed x-gates, original-time chunk for bwd dir
    whhf_hbm,     # (H, 4H) HBM ref (memory_space=ANY)
    whhb_hbm,     # (H, 4H) HBM ref (memory_space=ANY)
    outf_ref,     # (chunk, Bp, H) f32
    outb_ref,     # (chunk, Bp, H) f32
    hf, cf, hb, cb,          # (Bp, H) f32 VMEM scratch -- carried state, persists across chunks
    whhf_v, whhb_v,          # (H, 4H) VMEM scratch -- resident weights, loaded once
    sems,                    # DMA semaphores, shape (2,)
    *, chunk, hidden, compute_dtype,
):
    c = pl.program_id(0)
    H = hidden
    Bp = hf.shape[0]

    @pl.when(c == 0)
    def _init():
        # Single-buffered weight residency: copy W_hh (fwd/bwd) into VMEM exactly once.
        cp_f = pltpu.make_async_copy(whhf_hbm, whhf_v, sems.at[0])
        cp_b = pltpu.make_async_copy(whhb_hbm, whhb_v, sems.at[1])
        cp_f.start()
        cp_b.start()
        hf[...] = jnp.zeros_like(hf)
        cf[...] = jnp.zeros_like(cf)
        hb[...] = jnp.zeros_like(hb)
        cb[...] = jnp.zeros_like(cb)
        cp_f.wait()
        cp_b.wait()

    whh_f = whhf_v[...]
    whh_b = whhb_v[...]

    aligned = (H % 128) == 0
    if not aligned:
        # Lane mask selecting the "g" gate block: compute tanh/sigmoid full-width and select,
        # instead of four sub-lane-tile slices of the raw gates.
        lane = jax.lax.broadcasted_iota(jnp.int32, (Bp, 4 * H), 1)
        is_g_lane = (lane >= 2 * H) & (lane < 3 * H)

    def cell(gx, h, c_prev, whh):
        # gates layout follows PyTorch: [i, f, g, o] along the 4H axis.
        gates = gx + jnp.dot(h.astype(compute_dtype), whh,
                             preferred_element_type=jnp.float32)
        if aligned:
            i = jax.nn.sigmoid(gates[:, 0 * H:1 * H])
            f = jax.nn.sigmoid(gates[:, 1 * H:2 * H])
            g = jnp.tanh(gates[:, 2 * H:3 * H])
            o = jax.nn.sigmoid(gates[:, 3 * H:4 * H])
        else:
            act = jnp.where(is_g_lane, jnp.tanh(gates), jax.nn.sigmoid(gates))
            i = act[:, 0 * H:1 * H]
            f = act[:, 1 * H:2 * H]
            g = act[:, 2 * H:3 * H]
            o = act[:, 3 * H:4 * H]
        c_new = f * c_prev + i * g
        h_new = o * jnp.tanh(c_new)
        return h_new, c_new

    # Carry h/c in registers across the (statically unrolled) chunk; scratch touched once.
    h_f, c_f = hf[...], cf[...]
    h_b, c_b = hb[...], cb[...]
    for s in range(chunk):
        # forward direction: original time t = c*chunk + s
        h_f, c_f = cell(gxf_ref[s], h_f, c_f, whh_f)
        outf_ref[s] = h_f
        # backward direction: original time t = T-1 - (c*chunk + s)  == within-block offset chunk-1-s
        h_b, c_b = cell(gxb_ref[chunk - 1 - s], h_b, c_b, whh_b)
        outb_ref[chunk - 1 - s] = h_b
    hf[...] = h_f
    cf[...] = c_f
    hb[...] = h_b
    cb[...] = c_b


def _bilstm_recurrence(gx_f, gx_b, whh_f, whh_b, *, chunk):
    """gx_*: (T, Bp, 4H) f32.  whh_*: (H, 4H).  Returns (out_f, out_b) each (T, Bp, H) f32."""
    T, Bp, G = gx_f.shape
    H = G // 4
    assert T % chunk == 0, (T, chunk)
    nc = T // chunk
    w_itemsize = whh_f.dtype.itemsize

    # Explicit VMEM budgeting (blocks are double-buffered by the pipeline; weights/state are not).
    block_bytes = 2 * 2 * chunk * Bp * (4 * H + H) * 4
    resident_bytes = 2 * H * 4 * H * w_itemsize + 4 * Bp * H * 4
    vmem_limit = int(min(max(2 * (block_bytes + resident_bytes), 32 << 20), 64 << 20))

    flops = 2 * T * Bp * H * (4 * H) * 2          # recurrent matmuls, both directions
    transcendentals = 10 * T * Bp * H             # sigmoid/tanh
    bytes_accessed = (2 * T * Bp * 4 * H * 4      # gates_x in
                      + 2 * T * Bp * H * 4        # hidden out
                      + 2 * H * 4 * H * w_itemsize)

    kernel = functools.partial(
        _bilstm_chunk_kernel, chunk=chunk, hidden=H, compute_dtype=whh_f.dtype)

    out_f, out_b = pl.pallas_call(
        kernel,
        out_shape=(
            jax.ShapeDtypeStruct((T, Bp, H), jnp.float32),
            jax.ShapeDtypeStruct((T, Bp, H), jnp.float32),
        ),
        grid_spec=pltpu.PrefetchScalarGridSpec(
            num_scalar_prefetch=0,
            grid=(nc,),
            in_specs=[
                pl.BlockSpec((chunk, Bp, 4 * H), lambda c: (c, 0, 0)),           # fwd gates_x
                pl.BlockSpec((chunk, Bp, 4 * H), lambda c: (nc - 1 - c, 0, 0)),  # bwd gates_x
                pl.BlockSpec(memory_space=pl.ANY),   # W_hh fwd stays in HBM; copied once
                pl.BlockSpec(memory_space=pl.ANY),   # W_hh bwd stays in HBM; copied once
            ],
            out_specs=[
                pl.BlockSpec((chunk, Bp, H), lambda c: (c, 0, 0)),
                pl.BlockSpec((chunk, Bp, H), lambda c: (nc - 1 - c, 0, 0)),
            ],
            scratch_shapes=[
                pltpu.VMEM((Bp, H), jnp.float32),        # h fwd
                pltpu.VMEM((Bp, H), jnp.float32),        # c fwd
                pltpu.VMEM((Bp, H), jnp.float32),        # h bwd
                pltpu.VMEM((Bp, H), jnp.float32),        # c bwd
                pltpu.VMEM((H, 4 * H), whh_f.dtype),     # resident W_hh fwd (single-buffered)
                pltpu.VMEM((H, 4 * H), whh_b.dtype),     # resident W_hh bwd (single-buffered)
                pltpu.SemaphoreType.DMA((2,)),
            ],
        ),
        compiler_params=pltpu.CompilerParams(
            dimension_semantics=("arbitrary",),          # sequential recurrence over time chunks
            vmem_limit_bytes=vmem_limit,
        ),
        cost_estimate=pl.CostEstimate(
            flops=flops, transcendentals=transcendentals, bytes_accessed=bytes_accessed),
    )(gx_f, gx_b, whh_f, whh_b)
    return out_f, out_b


# ----------------------------------------------------------------------------
# Full module forward (glue in plain JAX)
# ----------------------------------------------------------------------------
def bilstm_forward(token_ids, params, *, compute_dtype=jnp.float32, chunk=None):
    B, T = token_ids.shape
    H = params["whh_f"].shape[0]

    # Embedding gather directly in time-major (T, B, E) layout -- no post-gather transpose.
    emb = jnp.take(params["embedding"], token_ids.T, axis=0).astype(jnp.float32)
    # TODO(synk): nn.Dropout treated as identity (eval-mode); training-mode PRNG dropout not implemented.

    # Pad batch to the f32 sublane tile (8) so kernel vregs / stores run less masked.
    Bp = -(-B // 8) * 8
    if Bp != B:
        emb = jnp.pad(emb, ((0, 0), (0, Bp - B), (0, 0)))

    cd = compute_dtype
    emb_c = emb.astype(cd)
    wih_f = params["wih_f"].astype(cd)
    wih_b = params["wih_b"].astype(cd)
    whh_f = params["whh_f"].astype(cd)
    whh_b = params["whh_b"].astype(cd)

    # Hoisted input projection: one big (T*B, E) x (E, 4H) matmul per direction, f32 accumulation.
    gx_f = (jnp.einsum("tbe,eg->tbg", emb_c, wih_f, preferred_element_type=jnp.float32)
            + params["b_f"]).astype(jnp.float32)
    gx_b = (jnp.einsum("tbe,eg->tbg", emb_c, wih_b, preferred_element_type=jnp.float32)
            + params["b_b"]).astype(jnp.float32)

    if chunk is None:
        chunk = next(tc for tc in (16, 8, 4, 2, 1) if T % tc == 0)

    out_f, out_b = _bilstm_recurrence(gx_f, gx_b, whh_f, whh_b, chunk=chunk)

    # Concat fwd/bwd hidden states, return batch-first like nn.LSTM(batch_first=True).
    scores = jnp.concatenate([out_f, out_b], axis=-1)    # (T, Bp, 2H)
    return jnp.transpose(scores, (1, 0, 2))[:B]          # (B, T, 2H)


# ----------------------------------------------------------------------------
# Pure-JAX reference LSTM for correctness checking
# ----------------------------------------------------------------------------
def _lstm_ref_dir(emb, wih, whh, b):  # emb (B, T, E) -> (B, T, H)
    B, T, E = emb.shape
    H = whh.shape[0]

    def step(carry, x):
        h, c = carry
        gates = x @ wih + h @ whh + b
        i, f, g, o = jnp.split(gates, 4, axis=-1)
        i, f, o = jax.nn.sigmoid(i), jax.nn.sigmoid(f), jax.nn.sigmoid(o)
        g = jnp.tanh(g)
        c_new = f * c + i * g
        h_new = o * jnp.tanh(c_new)
        return (h_new, c_new), h_new

    init = (jnp.zeros((B, H), jnp.float32), jnp.zeros((B, H), jnp.float32))
    _, hs = jax.lax.scan(step, init, jnp.swapaxes(emb, 0, 1))
    return jnp.swapaxes(hs, 0, 1)


def bilstm_reference(token_ids, params):
    emb = jnp.take(params["embedding"], token_ids, axis=0).astype(jnp.float32)
    out_f = _lstm_ref_dir(emb, params["wih_f"], params["whh_f"], params["b_f"][0])
    out_b = _lstm_ref_dir(emb[:, ::-1, :], params["wih_b"], params["whh_b"], params["b_b"][0])[:, ::-1, :]
    return jnp.concatenate([out_f, out_b], axis=-1)


# ----------------------------------------------------------------------------
# Deterministic parameter init (PyTorch-like shapes / init ranges)
# ----------------------------------------------------------------------------
def init_params(key, vocab_size, emb_size, hidden_size, out_size):
    H, E = hidden_size, emb_size
    ks = jax.random.split(key, 12)
    bound = 1.0 / np.sqrt(H)
    u = lambda k, shape: jax.random.uniform(k, shape, jnp.float32, -bound, bound)

    params = {
        "embedding": jax.random.normal(ks[0], (vocab_size, E), jnp.float32),
        # W_ih / W_hh stored transposed (E,4H)/(H,4H); b = b_ih + b_hh. Gate order [i,f,g,o].
        "wih_f": u(ks[1], (E, 4 * H)),
        "whh_f": u(ks[2], (H, 4 * H)),
        "b_f": (u(ks[3], (1, 4 * H)) + u(ks[4], (1, 4 * H))),
        "wih_b": u(ks[5], (E, 4 * H)),
        "whh_b": u(ks[6], (H, 4 * H)),
        "b_b": (u(ks[7], (1, 4 * H)) + u(ks[8], (1, 4 * H))),
        # fc exists in __init__ but is NOT used in forward(); kept for shape fidelity.
        "fc_w": u(ks[9], (out_size, 2 * H)),
        "fc_b": u(ks[10], (out_size,)),
    }
    return params


if __name__ == "__main__":
    VOCAB, EMB, HIDDEN, OUT = 50, 16, 32, 10
    B, T = 2, 8

    key = jax.random.PRNGKey(0)
    pkey, xkey = jax.random.split(key)
    params = init_params(pkey, VOCAB, EMB, HIDDEN, OUT)
    token_ids = jax.random.randint(xkey, (B, T), 0, VOCAB, dtype=jnp.int32)

    ref = bilstm_reference(token_ids, params)

    # f32 path: tight parity with the pure-JAX reference.
    scores = jax.block_until_ready(jax.jit(bilstm_forward)(token_ids, params))
    assert scores.shape == (B, T, 2 * HIDDEN), scores.shape
    np.testing.assert_allclose(np.asarray(scores), np.asarray(ref), rtol=1e-5, atol=1e-5)

    # bf16 MXU-operand path (f32 accumulation / state / nonlinearities): looser tolerance.
    fwd_bf16 = jax.jit(functools.partial(bilstm_forward, compute_dtype=jnp.bfloat16))
    scores_bf16 = jax.block_until_ready(fwd_bf16(token_ids, params))
    np.testing.assert_allclose(np.asarray(scores_bf16), np.asarray(ref), rtol=5e-2, atol=5e-2)

    print("KERNEL_OK")
</pallas_src>

<mosaic_0001>
module attributes {stable_mosaic.version = 11 : i64} {
  func.func @_bilstm_chunk_kernel(%arg0: i32, %arg1: memref<8x8x128xf32, #tpu.memory_space<vmem>>, %arg2: memref<8x8x128xf32, #tpu.memory_space<vmem>>, %arg3: memref<32x128xf32, #tpu.memory_space<any>>, %arg4: memref<32x128xf32, #tpu.memory_space<any>>, %arg5: memref<8x8x32xf32, #tpu.memory_space<vmem>>, %arg6: memref<8x8x32xf32, #tpu.memory_space<vmem>>, %arg7: memref<8x32xf32, #tpu.memory_space<vmem>>, %arg8: memref<8x32xf32, #tpu.memory_space<vmem>>, %arg9: memref<8x32xf32, #tpu.memory_space<vmem>>, %arg10: memref<8x32xf32, #tpu.memory_space<vmem>>, %arg11: memref<32x128xf32, #tpu.memory_space<vmem>>, %arg12: memref<32x128xf32, #tpu.memory_space<vmem>>, %arg13: memref<2x!tpu.dma_semaphore, #tpu.memory_space<semaphore_mem>>) attributes {dimension_semantics = [#tpu.dimension_semantics<arbitrary>], iteration_bounds = array<i64: 1>, scalar_prefetch = 0 : i64, scratch_operands = 7 : i64, tpu.core_type = #tpu.core_type<tc>, window_params = [{transform_indices = @transform_0, window_bounds = array<i64: 8, 8, 128>}, {transform_indices = @transform_1, window_bounds = array<i64: 8, 8, 128>}, {}, {}, {transform_indices = @transform_4, window_bounds = array<i64: 8, 8, 32>}, {transform_indices = @transform_5, window_bounds = array<i64: 8, 8, 32>}]} {
    %c0_i32 = arith.constant 0 : i32
    %0 = arith.cmpi eq, %arg0, %c0_i32 : i32
    %1 = arith.extui %0 : i1 to i32
    %c0_i32_0 = arith.constant 0 : i32
    %2 = arith.cmpi ne, %1, %c0_i32_0 : i32
    scf.if %2 {
      %c0_i32_140 = arith.constant 0 : i32
      %387 = tpu.memref_slice %arg13[%c0_i32_140] : memref<2x!tpu.dma_semaphore, #tpu.memory_space<semaphore_mem>> -> memref<1x!tpu.dma_semaphore, #tpu.memory_space<semaphore_mem>>
      %388 = tpu.memref_squeeze %387 : memref<1x!tpu.dma_semaphore, #tpu.memory_space<semaphore_mem>> -> memref<!tpu.dma_semaphore, #tpu.memory_space<semaphore_mem>>
      tpu.enqueue_dma source(%arg3 : memref<32x128xf32, #tpu.memory_space<any>>) target(%arg11 : memref<32x128xf32, #tpu.memory_space<vmem>>) target_semaphore(%388 : memref<!tpu.dma_semaphore, #tpu.memory_space<semaphore_mem>>)
      %c1_i32 = arith.constant 1 : i32
      %389 = tpu.memref_slice %arg13[%c1_i32] : memref<2x!tpu.dma_semaphore, #tpu.memory_space<semaphore_mem>> -> memref<1x!tpu.dma_semaphore, #tpu.memory_space<semaphore_mem>>
      %390 = tpu.memref_squeeze %389 : memref<1x!tpu.dma_semaphore, #tpu.memory_space<semaphore_mem>> -> memref<!tpu.dma_semaphore, #tpu.memory_space<semaphore_mem>>
      tpu.enqueue_dma source(%arg4 : memref<32x128xf32, #tpu.memory_space<any>>) target(%arg12 : memref<32x128xf32, #tpu.memory_space<vmem>>) target_semaphore(%390 : memref<!tpu.dma_semaphore, #tpu.memory_space<semaphore_mem>>)
      %cst_141 = arith.constant 0.000000e+00 : f32
      %391 = vector.broadcast %cst_141 : f32 to vector<8x32xf32>
      %c0_142 = arith.constant 0 : index
      %c0_143 = arith.constant 0 : index
      %392 = vector.load %arg7[%c0_142, %c0_143] : memref<8x32xf32, #tpu.memory_space<vmem>>, vector<8x32xf32>
      tpu.vector_store %arg7[%c0_142, %c0_143], %391 {strides = array<i32>} : memref<8x32xf32, #tpu.memory_space<vmem>>, vector<8x32xf32>,
      %cst_144 = arith.constant 0.000000e+00 : f32
      %393 = vector.broadcast %cst_144 : f32 to vector<8x32xf32>
      %c0_145 = arith.constant 0 : index
      %c0_146 = arith.constant 0 : index
      %394 = vector.load %arg8[%c0_145, %c0_146] : memref<8x32xf32, #tpu.memory_space<vmem>>, vector<8x32xf32>
      tpu.vector_store %arg8[%c0_145, %c0_146], %393 {strides = array<i32>} : memref<8x32xf32, #tpu.memory_space<vmem>>, vector<8x32xf32>,
      %cst_147 = arith.constant 0.000000e+00 : f32
      %395 = vector.broadcast %cst_147 : f32 to vector<8x32xf32>
      %c0_148 = arith.constant 0 : index
      %c0_149 = arith.constant 0 : index
      %396 = vector.load %arg9[%c0_148, %c0_149] : memref<8x32xf32, #tpu.memory_space<vmem>>, vector<8x32xf32>
      tpu.vector_store %arg9[%c0_148, %c0_149], %395 {strides = array<i32>} : memref<8x32xf32, #tpu.memory_space<vmem>>, vector<8x32xf32>,
      %cst_150 = arith.constant 0.000000e+00 : f32
      %397 = vector.broadcast %cst_150 : f32 to vector<8x32xf32>
      %c0_151 = arith.constant 0 : index
      %c0_152 = arith.constant 0 : index
      %398 = vector.load %arg10[%c0_151, %c0_152] : memref<8x32xf32, #tpu.memory_space<vmem>>, vector<8x32xf32>
      tpu.vector_store %arg10[%c0_151, %c0_152], %397 {strides = array<i32>} : memref<8x32xf32, #tpu.memory_space<vmem>>, vector<8x32xf32>,
      %c0_i32_153 = arith.constant 0 : i32
      %399 = tpu.memref_slice %arg13[%c0_i32_153] : memref<2x!tpu.dma_semaphore, #tpu.memory_space<semaphore_mem>> -> memref<1x!tpu.dma_semaphore, #tpu.memory_space<semaphore_mem>>
      %400 = tpu.memref_squeeze %399 : memref<1x!tpu.dma_semaphore, #tpu.memory_space<semaphore_mem>> -> memref<!tpu.dma_semaphore, #tpu.memory_space<semaphore_mem>>
      tpu.wait_dma2 semaphore(%400 : memref<!tpu.dma_semaphore, #tpu.memory_space<semaphore_mem>>) src(%arg3 : memref<32x128xf32, #tpu.memory_space<any>>) dst(%arg11 : memref<32x128xf32, #tpu.memory_space<vmem>>)
      %c1_i32_154 = arith.constant 1 : i32
      %401 = tpu.memref_slice %arg13[%c1_i32_154] : memref<2x!tpu.dma_semaphore, #tpu.memory_space<semaphore_mem>> -> memref<1x!tpu.dma_semaphore, #tpu.memory_space<semaphore_mem>>
      %402 = tpu.memref_squeeze %401 : memref<1x!tpu.dma_semaphore, #tpu.memory_space<semaphore_mem>> -> memref<!tpu.dma_semaphore, #tpu.memory_space<semaphore_mem>>
      tpu.wait_dma2 semaphore(%402 : memref<!tpu.dma_semaphore, #tpu.memory_space<semaphore_mem>>) src(%arg4 : memref<32x128xf32, #tpu.memory_space<any>>) dst(%arg12 : memref<32x128xf32, #tpu.memory_space<vmem>>)
    } else {
    }
    %c0 = arith.constant 0 : index
    %c0_1 = arith.constant 0 : index
    %3 = vector.load %arg11[%c0, %c0_1] : memref<32x128xf32, #tpu.memory_space<vmem>>, vector<32x128xf32>
    %c0_2 = arith.constant 0 : index
    %c0_3 = arith.constant 0 : index
    %4 = vector.load %arg12[%c0_2, %c0_3] : memref<32x128xf32, #tpu.memory_space<vmem>>, vector<32x128xf32>
    %5 = tpu.iota {dimensions = array<i32: 1>} : vector<8x128xi32>
    %c64_i32 = arith.constant 64 : i32
    %6 = vector.broadcast %c64_i32 : i32 to vector<8x128xi32>
    %7 = arith.cmpi sge, %5, %6 : vector<8x128xi32>
    %c96_i32 = arith.constant 96 : i32
    %8 = vector.broadcast %c96_i32 : i32 to vector<8x128xi32>
    %9 = arith.cmpi slt, %5, %8 : vector<8x128xi32>
    %10 = arith.andi %7, %9 : vector<8x128xi1>
    %c0_4 = arith.constant 0 : index
    %c0_5 = arith.constant 0 : index
    %11 = vector.load %arg7[%c0_4, %c0_5] : memref<8x32xf32, #tpu.memory_space<vmem>>, vector<8x32xf32>
    %c0_6 = arith.constant 0 : index
    %c0_7 = arith.constant 0 : index
    %12 = vector.load %arg8[%c0_6, %c0_7] : memref<8x32xf32, #tpu.memory_space<vmem>>, vector<8x32xf32>
    %c0_8 = arith.constant 0 : index
    %c0_9 = arith.constant 0 : index
    %13 = vector.load %arg9[%c0_8, %c0_9] : memref<8x32xf32, #tpu.memory_space<vmem>>, vector<8x32xf32>
    %c0_10 = arith.constant 0 : index
    %c0_11 = arith.constant 0 : index
    %14 = vector.load %arg10[%c0_10, %c0_11] : memref<8x32xf32, #tpu.memory_space<vmem>>, vector<8x32xf32>
    %c0_12 = arith.constant 0 : index
    %c0_13 = arith.constant 0 : index
    %c0_14 = arith.constant 0 : index
    %15 = vector.load %arg1[%c0_12, %c0_13, %c0_14] : memref<8x8x128xf32, #tpu.memory_space<vmem>>, vector<1x8x128xf32>
    %16 = vector.shape_cast %15 : vector<1x8x128xf32> to vector<8x128xf32>
    %cst = arith.constant dense<0.000000e+00> : vector<8x128xf32>
    %17 = tpu.matmul %11, %3, %cst {dimension_numbers = #tpu.dot_dimension_numbers<[1], [0], [0], [1], [0, 0, 1, 1], [], []>} : vector<8x32xf32>, vector<32x128xf32>, vector<8x128xf32> -> vector<8x128xf32>
    %18 = arith.addf %16, %17 : vector<8x128xf32>
    %19 = math.tanh %18 : vector<8x128xf32>
    %20 = arith.negf %18 : vector<8x128xf32>
    %21 = math.exp %20 : vector<8x128xf32>
    %cst_15 = arith.constant 1.000000e+00 : f32
    %22 = vector.broadcast %cst_15 : f32 to vector<8x128xf32>
    %23 = arith.addf %22, %21 : vector<8x128xf32>
    %24 = arith.divf %22, %23 : vector<8x128xf32>
    %25 = arith.select %10, %19, %24 : vector<8x128xi1>, vector<8x128xf32>
    %26 = vector.extract_strided_slice %25 {offsets = [0, 0], sizes = [8, 32], strides = [1, 1]} : vector<8x128xf32> to vector<8x32xf32>
    %27 = vector.extract_strided_slice %25 {offsets = [0, 32], sizes = [8, 32], strides = [1, 1]} : vector<8x128xf32> to vector<8x32xf32>
    %28 = vector.extract_strided_slice %25 {offsets = [0, 64], sizes = [8, 32], strides = [1, 1]} : vector<8x128xf32> to vector<8x32xf32>
    %29 = vector.extract_strided_slice %25 {offsets = [0, 96], sizes = [8, 32], strides = [1, 1]} : vector<8x128xf32> to vector<8x32xf32>
    %30 = arith.mulf %27, %12 : vector<8x32xf32>
    %31 = arith.mulf %26, %28 : vector<8x32xf32>
    %32 = arith.addf %30, %31 : vector<8x32xf32>
    %33 = math.tanh %32 : vector<8x32xf32>
    %34 = arith.mulf %29, %33 : vector<8x32xf32>
    %c0_16 = arith.constant 0 : index
    %c0_17 = arith.constant 0 : index
    %c0_18 = arith.constant 0 : index
    %35 = vector.load %arg5[%c0_16, %c0_17, %c0_18] : memref<8x8x32xf32, #tpu.memory_space<vmem>>, vector<1x8x32xf32>
    %36 = vector.shape_cast %35 : vector<1x8x32xf32> to vector<8x32xf32>
    %37 = vector.shape_cast %34 : vector<8x32xf32> to vector<1x8x32xf32>
    tpu.vector_store %arg5[%c0_16, %c0_17, %c0_18], %37 {strides = array<i32>} : memref<8x8x32xf32, #tpu.memory_space<vmem>>, vector<1x8x32xf32>,
    %c7 = arith.constant 7 : index
    %c0_19 = arith.constant 0 : index
    %c0_20 = arith.constant 0 : index
    %38 = vector.load %arg2[%c7, %c0_19, %c0_20] : memref<8x8x128xf32, #tpu.memory_space<vmem>>, vector<1x8x128xf32>
    %39 = vector.shape_cast %38 : vector<1x8x128xf32> to vector<8x128xf32>
    %cst_21 = arith.constant dense<0.000000e+00> : vector<8x128xf32>
    %40 = tpu.matmul %13, %4, %cst_21 {dimension_numbers = #tpu.dot_dimension_numbers<[1], [0], [0], [1], [0, 0, 1, 1], [], []>} : vector<8x32xf32>, vector<32x128xf32>, vector<8x128xf32> -> vector<8x128xf32>
    %41 = arith.addf %39, %40 : vector<8x128xf32>
    %42 = math.tanh %41 : vector<8x128xf32>
    %43 = arith.negf %41 : vector<8x128xf32>
    %44 = math.exp %43 : vector<8x128xf32>
    %cst_22 = arith.constant 1.000000e+00 : f32
    %45 = vector.broadcast %cst_22 : f32 to vector<8x128xf32>
    %46 = arith.addf %45, %44 : vector<8x128xf32>
    %47 = arith.divf %45, %46 : vector<8x128xf32>
    %48 = arith.select %10, %42, %47 : vector<8x128xi1>, vector<8x128xf32>
    %49 = vector.extract_strided_slice %48 {offsets = [0, 0], sizes = [8, 32], strides = [1, 1]} : vector<8x128xf32> to vector<8x32xf32>
    %50 = vector.extract_strided_slice %48 {offsets = [0, 32], sizes = [8, 32], strides = [1, 1]} : vector<8x128xf32> to vector<8x32xf32>
    %51 = vector.extract_strided_slice %48 {offsets = [0, 64], sizes = [8, 32], strides = [1, 1]} : vector<8x128xf32> to vector<8x32xf32>
    %52 = vector.extract_strided_slice %48 {offsets = [0, 96], sizes = [8, 32], strides = [1, 1]} : vector<8x128xf32> to vector<8x32xf32>
    %53 = arith.mulf %50, %14 : vector<8x32xf32>
    %54 = arith.mulf %49, %51 : vector<8x32xf32>
    %55 = arith.addf %53, %54 : vector<8x32xf32>
    %56 = math.tanh %55 : vector<8x32xf32>
    %57 = arith.mulf %52, %56 : vector<8x32xf32>
    %c7_23 = arith.constant 7 : index
    %c0_24 = arith.constant 0 : index
    %c0_25 = arith.constant 0 : index
    %58 = vector.load %arg6[%c7_23, %c0_24, %c0_25] : memref<8x8x32xf32, #tpu.memory_space<vmem>>, vector<1x8x32xf32>
    %59 = vector.shape_cast %58 : vector<1x8x32xf32> to vector<8x32xf32>
    %60 = vector.shape_cast %57 : vector<8x32xf32> to vector<1x8x32xf32>
    tpu.vector_store %arg6[%c7_23, %c0_24, %c0_25], %60 {strides = array<i32>} : memref<8x8x32xf32, #tpu.memory_space<vmem>>, vector<1x8x32xf32>,
    %c1 = arith.constant 1 : index
    %c0_26 = arith.constant 0 : index
    %c0_27 = arith.constant 0 : index
    %61 = vector.load %arg1[%c1, %c0_26, %c0_27] : memref<8x8x128xf32, #tpu.memory_space<vmem>>, vector<1x8x128xf32>
    %62 = vector.shape_cast %61 : vector<1x8x128xf32> to vector<8x128xf32>
    %cst_28 = arith.constant dense<0.000000e+00> : vector<8x128xf32>
    %63 = tpu.matmul %34, %3, %cst_28 {dimension_numbers = #tpu.dot_dimension_numbers<[1], [0], [0], [1], [0, 0, 1, 1], [], []>} : vector<8x32xf32>, vector<32x128xf32>, vector<8x128xf32> -> vector<8x128xf32>
    %64 = arith.addf %62, %63 : vector<8x128xf32>
    %65 = math.tanh %64 : vector<8x128xf32>
    %66 = arith.negf %64 : vector<8x128xf32>
    %67 = math.exp %66 : vector<8x128xf32>
    %cst_29 = arith.constant 1.000000e+00 : f32
    %68 = vector.broadcast %cst_29 : f32 to vector<8x128xf32>
    %69 = arith.addf %68, %67 : vector<8x128xf32>
    %70 = arith.divf %68, %69 : vector<8x128xf32>
    %71 = arith.select %10, %65, %70 : vector<8x128xi1>, vector<8x128xf32>
    %72 = vector.extract_strided_slice %71 {offsets = [0, 0], sizes = [8, 32], strides = [1, 1]} : vector<8x128xf32> to vector<8x32xf32>
    %73 = vector.extract_strided_slice %71 {offsets = [0, 32], sizes = [8, 32], strides = [1, 1]} : vector<8x128xf32> to vector<8x32xf32>
    %74 = vector.extract_strided_slice %71 {offsets = [0, 64], sizes = [8, 32], strides = [1, 1]} : vector<8x128xf32> to vector<8x32xf32>
    %75 = vector.extract_strided_slice %71 {offsets = [0, 96], sizes = [8, 32], strides = [1, 1]} : vector<8x128xf32> to vector<8x32xf32>
    %76 = arith.mulf %73, %32 : vector<8x32xf32>
    %77 = arith.mulf %72, %74 : vector<8x32xf32>
    %78 = arith.addf %76, %77 : vector<8x32xf32>
    %79 = math.tanh %78 : vector<8x32xf32>
    %80 = arith.mulf %75, %79 : vector<8x32xf32>
    %c1_30 = arith.constant 1 : index
    %c0_31 = arith.constant 0 : index
    %c0_32 = arith.constant 0 : index
    %81 = vector.load %arg5[%c1_30, %c0_31, %c0_32] : memref<8x8x32xf32, #tpu.memory_space<vmem>>, vector<1x8x32xf32>
    %82 = vector.shape_cast %81 : vector<1x8x32xf32> to vector<8x32xf32>
    %83 = vector.shape_cast %80 : vector<8x32xf32> to vector<1x8x32xf32>
    tpu.vector_store %arg5[%c1_30, %c0_31, %c0_32], %83 {strides = array<i32>} : memref<8x8x32xf32, #tpu.memory_space<vmem>>, vector<1x8x32xf32>,
    %c6 = arith.constant 6 : index
    %c0_33 = arith.constant 0 : index
    %c0_34 = arith.constant 0 : index
    %84 = vector.load %arg2[%c6, %c0_33, %c0_34] : memref<8x8x128xf32, #tpu.memory_space<vmem>>, vector<1x8x128xf32>
    %85 = vector.shape_cast %84 : vector<1x8x128xf32> to vector<8x128xf32>
    %cst_35 = arith.constant dense<0.000000e+00> : vector<8x128xf32>
    %86 = tpu.matmul %57, %4, %cst_35 {dimension_numbers = #tpu.dot_dimension_numbers<[1], [0], [0], [1], [0, 0, 1, 1], [], []>} : vector<8x32xf32>, vector<32x128xf32>, vector<8x128xf32> -> vector<8x128xf32>
    %87 = arith.addf %85, %86 : vector<8x128xf32>
    %88 = math.tanh %87 : vector<8x128xf32>
    %89 = arith.negf %87 : vector<8x128xf32>
    %90 = math.exp %89 : vector<8x128xf32>
    %cst_36 = arith.constant 1.000000e+00 : f32
    %91 = vector.broadcast %cst_36 : f32 to vector<8x128xf32>
    %92 = arith.addf %91, %90 : vector<8x128xf32>
    %93 = arith.divf %91, %92 : vector<8x128xf32>
    %94 = arith.select %10, %88, %93 : vector<8x128xi1>, vector<8x128xf32>
    %95 = vector.extract_strided_slice %94 {offsets = [0, 0], sizes = [8, 32], strides = [1, 1]} : vector<8x128xf32> to vector<8x32xf32>
    %96 = vector.extract_strided_slice %94 {offsets = [0, 32], sizes = [8, 32], strides = [1, 1]} : vector<8x128xf32> to vector<8x32xf32>
    %97 = vector.extract_strided_slice %94 {offsets = [0, 64], sizes = [8, 32], strides = [1, 1]} : vector<8x128xf32> to vector<8x32xf32>
    %98 = vector.extract_strided_slice %94 {offsets = [0, 96], sizes = [8, 32], strides = [1, 1]} : vector<8x128xf32> to vector<8x32xf32>
    %99 = arith.mulf %96, %55 : vector<8x32xf32>
    %100 = arith.mulf %95, %97 : vector<8x32xf32>
    %101 = arith.addf %99, %100 : vector<8x32xf32>
    %102 = math.tanh %101 : vector<8x32xf32>
    %103 = arith.mulf %98, %102 : vector<8x32xf32>
    %c6_37 = arith.constant 6 : index
    %c0_38 = arith.constant 0 : index
    %c0_39 = arith.constant 0 : index
    %104 = vector.load %arg6[%c6_37, %c0_38, %c0_39] : memref<8x8x32xf32, #tpu.memory_space<vmem>>, vector<1x8x32xf32>
    %105 = vector.shape_cast %104 : vector<1x8x32xf32> to vector<8x32xf32>
    %106 = vector.shape_cast %103 : vector<8x32xf32> to vector<1x8x32xf32>
    tpu.vector_store %arg6[%c6_37, %c0_38, %c0_39], %106 {strides = array<i32>} : memref<8x8x32xf32, #tpu.memory_space<vmem>>, vector<1x8x32xf32>,
    %c2 = arith.constant 2 : index
    %c0_40 = arith.constant 0 : index
    %c0_41 = arith.constant 0 : index
    %107 = vector.load %arg1[%c2, %c0_40, %c0_41] : memref<8x8x128xf32, #tpu.memory_space<vmem>>, vector<1x8x128xf32>
    %108 = vector.shape_cast %107 : vector<1x8x128xf32> to vector<8x128xf32>
    %cst_42 = arith.constant dense<0.000000e+00> : vector<8x128xf32>
    %109 = tpu.matmul %80, %3, %cst_42 {dimension_numbers = #tpu.dot_dimension_numbers<[1], [0], [0], [1], [0, 0, 1, 1], [], []>} : vector<8x32xf32>, vector<32x128xf32>, vector<8x128xf32> -> vector<8x128xf32>
    %110 = arith.addf %108, %109 : vector<8x128xf32>
    %111 = math.tanh %110 : vector<8x128xf32>
    %112 = arith.negf %110 : vector<8x128xf32>
    %113 = math.exp %112 : vector<8x128xf32>
    %cst_43 = arith.constant 1.000000e+00 : f32
    %114 = vector.broadcast %cst_43 : f32 to vector<8x128xf32>
    %115 = arith.addf %114, %113 : vector<8x128xf32>
    %116 = arith.divf %114, %115 : vector<8x128xf32>
    %117 = arith.select %10, %111, %116 : vector<8x128xi1>, vector<8x128xf32>
    %118 = vector.extract_strided_slice %117 {offsets = [0, 0], sizes = [8, 32], strides = [1, 1]} : vector<8x128xf32> to vector<8x32xf32>
    %119 = vector.extract_strided_slice %117 {offsets = [0, 32], sizes = [8, 32], strides = [1, 1]} : vector<8x128xf32> to vector<8x32xf32>
    %120 = vector.extract_strided_slice %117 {offsets = [0, 64], sizes = [8, 32], strides = [1, 1]} : vector<8x128xf32> to vector<8x32xf32>
    %121 = vector.extract_strided_slice %117 {offsets = [0, 96], sizes = [8, 32], strides = [1, 1]} : vector<8x128xf32> to vector<8x32xf32>
    %122 = arith.mulf %119, %78 : vector<8x32xf32>
    %123 = arith.mulf %118, %120 : vector<8x32xf32>
    %124 = arith.addf %122, %123 : vector<8x32xf32>
    %125 = math.tanh %124 : vector<8x32xf32>
    %126 = arith.mulf %121, %125 : vector<8x32xf32>
    %c2_44 = arith.constant 2 : index
    %c0_45 = arith.constant 0 : index
    %c0_46 = arith.constant 0 : index
    %127 = vector.load %arg5[%c2_44, %c0_45, %c0_46] : memref<8x8x32xf32, #tpu.memory_space<vmem>>, vector<1x8x32xf32>
    %128 = vector.shape_cast %127 : vector<1x8x32xf32> to vector<8x32xf32>
    %129 = vector.shape_cast %126 : vector<8x32xf32> to vector<1x8x32xf32>
    tpu.vector_store %arg5[%c2_44, %c0_45, %c0_46], %129 {strides = array<i32>} : memref<8x8x32xf32, #tpu.memory_space<vmem>>, vector<1x8x32xf32>,
    %c5 = arith.constant 5 : index
    %c0_47 = arith.constant 0 : index
    %c0_48 = arith.constant 0 : index
    %130 = vector.load %arg2[%c5, %c0_47, %c0_48] : memref<8x8x128xf32, #tpu.memory_space<vmem>>, vector<1x8x128xf32>
    %131 = vector.shape_cast %130 : vector<1x8x128xf32> to vector<8x128xf32>
    %cst_49 = arith.constant dense<0.000000e+00> : vector<8x128xf32>
    %132 = tpu.matmul %103, %4, %cst_49 {dimension_numbers = #tpu.dot_dimension_numbers<[1], [0], [0], [1], [0, 0, 1, 1], [], []>} : vector<8x32xf32>, vector<32x128xf32>, vector<8x128xf32> -> vector<8x128xf32>
    %133 = arith.addf %131, %132 : vector<8x128xf32>
    %134 = math.tanh %133 : vector<8x128xf32>
    %135 = arith.negf %133 : vector<8x128xf32>
    %136 = math.exp %135 : vector<8x128xf32>
    %cst_50 = arith.constant 1.000000e+00 : f32
    %137 = vector.broadcast %cst_50 : f32 to vector<8x128xf32>
    %138 = arith.addf %137, %136 : vector<8x128xf32>
    %139 = arith.divf %137, %138 : vector<8x128xf32>
    %140 = arith.select %10, %134, %139 : vector<8x128xi1>, vector<8x128xf32>
    %141 = vector.extract_strided_slice %140 {offsets = [0, 0], sizes = [8, 32], strides = [1, 1]} : vector<8x128xf32> to vector<8x32xf32>
    %142 = vector.extract_strided_slice %140 {offsets = [0, 32], sizes = [8, 32], strides = [1, 1]} : vector<8x128xf32> to vector<8x32xf32>
    %143 = vector.extract_strided_slice %140 {offsets = [0, 64], sizes = [8, 32], strides = [1, 1]} : vector<8x128xf32> to vector<8x32xf32>
    %144 = vector.extract_strided_slice %140 {offsets = [0, 96], sizes = [8, 32], strides = [1, 1]} : vector<8x128xf32> to vector<8x32xf32>
    %145 = arith.mulf %142, %101 : vector<8x32xf32>
    %146 = arith.mulf %141, %143 : vector<8x32xf32>
    %147 = arith.addf %145, %146 : vector<8x32xf32>
    %148 = math.tanh %147 : vector<8x32xf32>
    %149 = arith.mulf %144, %148 : vector<8x32xf32>
    %c5_51 = arith.constant 5 : index
    %c0_52 = arith.constant 0 : index
    %c0_53 = arith.constant 0 : index
    %150 = vector.load %arg6[%c5_51, %c0_52, %c0_53] : memref<8x8x32xf32, #tpu.memory_space<vmem>>, vector<1x8x32xf32>
    %151 = vector.shape_cast %150 : vector<1x8x32xf32> to vector<8x32xf32>
    %152 = vector.shape_cast %149 : vector<8x32xf32> to vector<1x8x32xf32>
    tpu.vector_store %arg6[%c5_51, %c0_52, %c0_53], %152 {strides = array<i32>} : memref<8x8x32xf32, #tpu.memory_space<vmem>>, vector<1x8x32xf32>,
    %c3 = arith.constant 3 : index
    %c0_54 = arith.constant 0 : index
    %c0_55 = arith.constant 0 : index
    %153 = vector.load %arg1[%c3, %c0_54, %c0_55] : memref<8x8x128xf32, #tpu.memory_space<vmem>>, vector<1x8x128xf32>
    %154 = vector.shape_cast %153 : vector<1x8x128xf32> to vector<8x128xf32>
    %cst_56 = arith.constant dense<0.000000e+00> : vector<8x128xf32>
    %155 = tpu.matmul %126, %3, %cst_56 {dimension_numbers = #tpu.dot_dimension_numbers<[1], [0], [0], [1], [0, 0, 1, 1], [], []>} : vector<8x32xf32>, vector<32x128xf32>, vector<8x128xf32> -> vector<8x128xf32>
    %156 = arith.addf %154, %155 : vector<8x128xf32>
    %157 = math.tanh %156 : vector<8x128xf32>
    %158 = arith.negf %156 : vector<8x128xf32>
    %159 = math.exp %158 : vector<8x128xf32>
    %cst_57 = arith.constant 1.000000e+00 : f32
    %160 = vector.broadcast %cst_57 : f32 to vector<8x128xf32>
    %161 = arith.addf %160, %159 : vector<8x128xf32>
    %162 = arith.divf %160, %161 : vector<8x128xf32>
    %163 = arith.select %10, %157, %162 : vector<8x128xi1>, vector<8x128xf32>
    %164 = vector.extract_strided_slice %163 {offsets = [0, 0], sizes = [8, 32], strides = [1, 1]} : vector<8x128xf32> to vector<8x32xf32>
    %165 = vector.extract_strided_slice %163 {offsets = [0, 32], sizes = [8, 32], strides = [1, 1]} : vector<8x128xf32> to vector<8x32xf32>
    %166 = vector.extract_strided_slice %163 {offsets = [0, 64], sizes = [8, 32], strides = [1, 1]} : vector<8x128xf32> to vector<8x32xf32>
    %167 = vector.extract_strided_slice %163 {offsets = [0, 96], sizes = [8, 32], strides = [1, 1]} : vector<8x128xf32> to vector<8x32xf32>
    %168 = arith.mulf %165, %124 : vector<8x32xf32>
    %169 = arith.mulf %164, %166 : vector<8x32xf32>
    %170 = arith.addf %168, %169 : vector<8x32xf32>
    %171 = math.tanh %170 : vector<8x32xf32>
    %172 = arith.mulf %167, %171 : vector<8x32xf32>
    %c3_58 = arith.constant 3 : index
    %c0_59 = arith.constant 0 : index
    %c0_60 = arith.constant 0 : index
    %173 = vector.load %arg5[%c3_58, %c0_59, %c0_60] : memref<8x8x32xf32, #tpu.memory_space<vmem>>, vector<1x8x32xf32>
    %174 = vector.shape_cast %173 : vector<1x8x32xf32> to vector<8x32xf32>
    %175 = vector.shape_cast %172 : vector<8x32xf32> to vector<1x8x32xf32>
    tpu.vector_store %arg5[%c3_58, %c0_59, %c0_60], %175 {strides = array<i32>} : memref<8x8x32xf32, #tpu.memory_space<vmem>>, vector<1x8x32xf32>,
    %c4 = arith.constant 4 : index
    %c0_61 = arith.constant 0 : index
    %c0_62 = arith.constant 0 : index
    %176 = vector.load %arg2[%c4, %c0_61, %c0_62] : memref<8x8x128xf32, #tpu.memory_space<vmem>>, vector<1x8x128xf32>
    %177 = vector.shape_cast %176 : vector<1x8x128xf32> to vector<8x128xf32>
    %cst_63 = arith.constant dense<0.000000e+00> : vector<8x128xf32>
    %178 = tpu.matmul %149, %4, %cst_63 {dimension_numbers = #tpu.dot_dimension_numbers<[1], [0], [0], [1], [0, 0, 1, 1], [], []>} : vector<8x32xf32>, vector<32x128xf32>, vector<8x128xf32> -> vector<8x128xf32>
    %179 = arith.addf %177, %178 : vector<8x128xf32>
    %180 = math.tanh %179 : vector<8x128xf32>
    %181 = arith.negf %179 : vector<8x128xf32>
    %182 = math.exp %181 : vector<8x128xf32>
    %cst_64 = arith.constant 1.000000e+00 : f32
    %183 = vector.broadcast %cst_64 : f32 to vector<8x128xf32>
    %184 = arith.addf %183, %182 : vector<8x128xf32>
    %185 = arith.divf %183, %184 : vector<8x128xf32>
    %186 = arith.select %10, %180, %185 : vector<8x128xi1>, vector<8x128xf32>
    %187 = vector.extract_strided_slice %186 {offsets = [0, 0], sizes = [8, 32], strides = [1, 1]} : vector<8x128xf32> to vector<8x32xf32>
    %188 = vector.extract_strided_slice %186 {offsets = [0, 32], sizes = [8, 32], strides = [1, 1]} : vector<8x128xf32> to vector<8x32xf32>
    %189 = vector.extract_strided_slice %186 {offsets = [0, 64], sizes = [8, 32], strides = [1, 1]} : vector<8x128xf32> to vector<8x32xf32>
    %190 = vector.extract_strided_slice %186 {offsets = [0, 96], sizes = [8, 32], strides = [1, 1]} : vector<8x128xf32> to vector<8x32xf32>
    %191 = arith.mulf %188, %147 : vector<8x32xf32>
    %192 = arith.mulf %187, %189 : vector<8x32xf32>
    %193 = arith.addf %191, %192 : vector<8x32xf32>
    %194 = math.tanh %193 : vector<8x32xf32>
    %195 = arith.mulf %190, %194 : vector<8x32xf32>
    %c4_65 = arith.constant 4 : index
    %c0_66 = arith.constant 0 : index
    %c0_67 = arith.constant 0 : index
    %196 = vector.load %arg6[%c4_65, %c0_66, %c0_67] : memref<8x8x32xf32, #tpu.memory_space<vmem>>, vector<1x8x32xf32>
    %197 = vector.shape_cast %196 : vector<1x8x32xf32> to vector<8x32xf32>
    %198 = vector.shape_cast %195 : vector<8x32xf32> to vector<1x8x32xf32>
    tpu.vector_store %arg6[%c4_65, %c0_66, %c0_67], %198 {strides = array<i32>} : memref<8x8x32xf32, #tpu.memory_space<vmem>>, vector<1x8x32xf32>,
    %c4_68 = arith.constant 4 : index
    %c0_69 = arith.constant 0 : index
    %c0_70 = arith.constant 0 : index
    %199 = vector.load %arg1[%c4_68, %c0_69, %c0_70] : memref<8x8x128xf32, #tpu.memory_space<vmem>>, vector<1x8x128xf32>
    %200 = vector.shape_cast %199 : vector<1x8x128xf32> to vector<8x128xf32>
    %cst_71 = arith.constant dense<0.000000e+00> : vector<8x128xf32>
    %201 = tpu.matmul %172, %3, %cst_71 {dimension_numbers = #tpu.dot_dimension_numbers<[1], [0], [0], [1], [0, 0, 1, 1], [], []>} : vector<8x32xf32>, vector<32x128xf32>, vector<8x128xf32> -> vector<8x128xf32>
    %202 = arith.addf %200, %201 : vector<8x128xf32>
    %203 = math.tanh %202 : vector<8x128xf32>
    %204 = arith.negf %202 : vector<8x128xf32>
    %205 = math.exp %204 : vector<8x128xf32>
    %cst_72 = arith.constant 1.000000e+00 : f32
    %206 = vector.broadcast %cst_72 : f32 to vector<8x128xf32>
    %207 = arith.addf %206, %205 : vector<8x128xf32>
    %208 = arith.divf %206, %207 : vector<8x128xf32>
    %209 = arith.select %10, %203, %208 : vector<8x128xi1>, vector<8x128xf32>
    %210 = vector.extract_strided_slice %209 {offsets = [0, 0], sizes = [8, 32], strides = [1, 1]} : vector<8x128xf32> to vector<8x32xf32>
    %211 = vector.extract_strided_slice %209 {offsets = [0, 32], sizes = [8, 32], strides = [1, 1]} : vector<8x128xf32> to vector<8x32xf32>
    %212 = vector.extract_strided_slice %209 {offsets = [0, 64], sizes = [8, 32], strides = [1, 1]} : vector<8x128xf32> to vector<8x32xf32>
    %213 = vector.extract_strided_slice %209 {offsets = [0, 96], sizes = [8, 32], strides = [1, 1]} : vector<8x128xf32> to vector<8x32xf32>
    %214 = arith.mulf %211, %170 : vector<8x32xf32>
    %215 = arith.mulf %210, %212 : vector<8x32xf32>
    %216 = arith.addf %214, %215 : vector<8x32xf32>
    %217 = math.tanh %216 : vector<8x32xf32>
    %218 = arith.mulf %213, %217 : vector<8x32xf32>
    %c4_73 = arith.constant 4 : index
    %c0_74 = arith.constant 0 : index
    %c0_75 = arith.constant 0 : index
    %219 = vector.load %arg5[%c4_73, %c0_74, %c0_75] : memref<8x8x32xf32, #tpu.memory_space<vmem>>, vector<1x8x32xf32>
    %220 = vector.shape_cast %219 : vector<1x8x32xf32> to vector<8x32xf32>
    %221 = vector.shape_cast %218 : vector<8x32xf32> to vector<1x8x32xf32>
    tpu.vector_store %arg5[%c4_73, %c0_74, %c0_75], %221 {strides = array<i32>} : memref<8x8x32xf32, #tpu.memory_space<vmem>>, vector<1x8x32xf32>,
    %c3_76 = arith.constant 3 : index
    %c0_77 = arith.constant 0 : index
    %c0_78 = arith.constant 0 : index
    %222 = vector.load %arg2[%c3_76, %c0_77, %c0_78] : memref<8x8x128xf32, #tpu.memory_space<vmem>>, vector<1x8x128xf32>
    %223 = vector.shape_cast %222 : vector<1x8x128xf32> to vector<8x128xf32>
    %cst_79 = arith.constant dense<0.000000e+00> : vector<8x128xf32>
    %224 = tpu.matmul %195, %4, %cst_79 {dimension_numbers = #tpu.dot_dimension_numbers<[1], [0], [0], [1], [0, 0, 1, 1], [], []>} : vector<8x32xf32>, vector<32x128xf32>, vector<8x128xf32> -> vector<8x128xf32>
    %225 = arith.addf %223, %224 : vector<8x128xf32>
    %226 = math.tanh %225 : vector<8x128xf32>
    %227 = arith.negf %225 : vector<8x128xf32>
    %228 = math.exp %227 : vector<8x128xf32>
    %cst_80 = arith.constant 1.000000e+00 : f32
    %229 = vector.broadcast %cst_80 : f32 to vector<8x128xf32>
    %230 = arith.addf %229, %228 : vector<8x128xf32>
    %231 = arith.divf %229, %230 : vector<8x128xf32>
    %232 = arith.select %10, %226, %231 : vector<8x128xi1>, vector<8x128xf32>
    %233 = vector.extract_strided_slice %232 {offsets = [0, 0], sizes = [8, 32], strides = [1, 1]} : vector<8x128xf32> to vector<8x32xf32>
    %234 = vector.extract_strided_slice %232 {offsets = [0, 32], sizes = [8, 32], strides = [1, 1]} : vector<8x128xf32> to vector<8x32xf32>
    %235 = vector.extract_strided_slice %232 {offsets = [0, 64], sizes = [8, 32], strides = [1, 1]} : vector<8x128xf32> to vector<8x32xf32>
    %236 = vector.extract_strided_slice %232 {offsets = [0, 96], sizes = [8, 32], strides = [1, 1]} : vector<8x128xf32> to vector<8x32xf32>
    %237 = arith.mulf %234, %193 : vector<8x32xf32>
    %238 = arith.mulf %233, %235 : vector<8x32xf32>
    %239 = arith.addf %237, %238 : vector<8x32xf32>
    %240 = math.tanh %239 : vector<8x32xf32>
    %241 = arith.mulf %236, %240 : vector<8x32xf32>
    %c3_81 = arith.constant 3 : index
    %c0_82 = arith.constant 0 : index
    %c0_83 = arith.constant 0 : index
    %242 = vector.load %arg6[%c3_81, %c0_82, %c0_83] : memref<8x8x32xf32, #tpu.memory_space<vmem>>, vector<1x8x32xf32>
    %243 = vector.shape_cast %242 : vector<1x8x32xf32> to vector<8x32xf32>
    %244 = vector.shape_cast %241 : vector<8x32xf32> to vector<1x8x32xf32>
    tpu.vector_store %arg6[%c3_81, %c0_82, %c0_83], %244 {strides = array<i32>} : memref<8x8x32xf32, #tpu.memory_space<vmem>>, vector<1x8x32xf32>,
    %c5_84 = arith.constant 5 : index
    %c0_85 = arith.constant 0 : index
    %c0_86 = arith.constant 0 : index
    %245 = vector.load %arg1[%c5_84, %c0_85, %c0_86] : memref<8x8x128xf32, #tpu.memory_space<vmem>>, vector<1x8x128xf32>
    %246 = vector.shape_cast %245 : vector<1x8x128xf32> to vector<8x128xf32>
    %cst_87 = arith.constant dense<0.000000e+00> : vector<8x128xf32>
    %247 = tpu.matmul %218, %3, %cst_87 {dimension_numbers = #tpu.dot_dimension_numbers<[1], [0], [0], [1], [0, 0, 1, 1], [], []>} : vector<8x32xf32>, vector<32x128xf32>, vector<8x128xf32> -> vector<8x128xf32>
    %248 = arith.addf %246, %247 : vector<8x128xf32>
    %249 = math.tanh %248 : vector<8x128xf32>
    %250 = arith.negf %248 : vector<8x128xf32>
    %251 = math.exp %250 : vector<8x128xf32>
    %cst_88 = arith.constant 1.000000e+00 : f32
    %252 = vector.broadcast %cst_88 : f32 to vector<8x128xf32>
    %253 = arith.addf %252, %251 : vector<8x128xf32>
    %254 = arith.divf %252, %253 : vector<8x128xf32>
    %255 = arith.select %10, %249, %254 : vector<8x128xi1>, vector<8x128xf32>
    %256 = vector.extract_strided_slice %255 {offsets = [0, 0], sizes = [8, 32], strides = [1, 1]} : vector<8x128xf32> to vector<8x32xf32>
    %257 = vector.extract_strided_slice %255 {offsets = [0, 32], sizes = [8, 32], strides = [1, 1]} : vector<8x128xf32> to vector<8x32xf32>
    %258 = vector.extract_strided_slice %255 {offsets = [0, 64], sizes = [8, 32], strides = [1, 1]} : vector<8x128xf32> to vector<8x32xf32>
    %259 = vector.extract_strided_slice %255 {offsets = [0, 96], sizes = [8, 32], strides = [1, 1]} : vector<8x128xf32> to vector<8x32xf32>
    %260 = arith.mulf %257, %216 : vector<8x32xf32>
    %261 = arith.mulf %256, %258 : vector<8x32xf32>
    %262 = arith.addf %260, %261 : vector<8x32xf32>
    %263 = math.tanh %262 : vector<8x32xf32>
    %264 = arith.mulf %259, %263 : vector<8x32xf32>
    %c5_89 = arith.constant 5 : index
    %c0_90 = arith.constant 0 : index
    %c0_91 = arith.constant 0 : index
    %265 = vector.load %arg5[%c5_89, %c0_90, %c0_91] : memref<8x8x32xf32, #tpu.memory_space<vmem>>, vector<1x8x32xf32>
    %266 = vector.shape_cast %265 : vector<1x8x32xf32> to vector<8x32xf32>
    %267 = vector.shape_cast %264 : vector<8x32xf32> to vector<1x8x32xf32>
    tpu.vector_store %arg5[%c5_89, %c0_90, %c0_91], %267 {strides = array<i32>} : memref<8x8x32xf32, #tpu.memory_space<vmem>>, vector<1x8x32xf32>,
    %c2_92 = arith.constant 2 : index
    %c0_93 = arith.constant 0 : index
    %c0_94 = arith.constant 0 : index
    %268 = vector.load %arg2[%c2_92, %c0_93, %c0_94] : memref<8x8x128xf32, #tpu.memory_space<vmem>>, vector<1x8x128xf32>
    %269 = vector.shape_cast %268 : vector<1x8x128xf32> to vector<8x128xf32>
    %cst_95 = arith.constant dense<0.000000e+00> : vector<8x128xf32>
    %270 = tpu.matmul %241, %4, %cst_95 {dimension_numbers = #tpu.dot_dimension_numbers<[1], [0], [0], [1], [0, 0, 1, 1], [], []>} : vector<8x32xf32>, vector<32x128xf32>, vector<8x128xf32> -> vector<8x128xf32>
    %271 = arith.addf %269, %270 : vector<8x128xf32>
    %272 = math.tanh %271 : vector<8x128xf32>
    %273 = arith.negf %271 : vector<8x128xf32>
    %274 = math.exp %273 : vector<8x128xf32>
    %cst_96 = arith.constant 1.000000e+00 : f32
    %275 = vector.broadcast %cst_96 : f32 to vector<8x128xf32>
    %276 = arith.addf %275, %274 : vector<8x128xf32>
    %277 = arith.divf %275, %276 : vector<8x128xf32>
    %278 = arith.select %10, %272, %277 : vector<8x128xi1>, vector<8x128xf32>
    %279 = vector.extract_strided_slice %278 {offsets = [0, 0], sizes = [8, 32], strides = [1, 1]} : vector<8x128xf32> to vector<8x32xf32>
    %280 = vector.extract_strided_slice %278 {offsets = [0, 32], sizes = [8, 32], strides = [1, 1]} : vector<8x128xf32> to vector<8x32xf32>
    %281 = vector.extract_strided_slice %278 {offsets = [0, 64], sizes = [8, 32], strides = [1, 1]} : vector<8x128xf32> to vector<8x32xf32>
    %282 = vector.extract_strided_slice %278 {offsets = [0, 96], sizes = [8, 32], strides = [1, 1]} : vector<8x128xf32> to vector<8x32xf32>
    %283 = arith.mulf %280, %239 : vector<8x32xf32>
    %284 = arith.mulf %279, %281 : vector<8x32xf32>
    %285 = arith.addf %283, %284 : vector<8x32xf32>
    %286 = math.tanh %285 : vector<8x32xf32>
    %287 = arith.mulf %282, %286 : vector<8x32xf32>
    %c2_97 = arith.constant 2 : index
    %c0_98 = arith.constant 0 : index
    %c0_99 = arith.constant 0 : index
    %288 = vector.load %arg6[%c2_97, %c0_98, %c0_99] : memref<8x8x32xf32, #tpu.memory_space<vmem>>, vector<1x8x32xf32>
    %289 = vector.shape_cast %288 : vector<1x8x32xf32> to vector<8x32xf32>
    %290 = vector.shape_cast %287 : vector<8x32xf32> to vector<1x8x32xf32>
    tpu.vector_store %arg6[%c2_97, %c0_98, %c0_99], %290 {strides = array<i32>} : memref<8x8x32xf32, #tpu.memory_space<vmem>>, vector<1x8x32xf32>,
    %c6_100 = arith.constant 6 : index
    %c0_101 = arith.constant 0 : index
    %c0_102 = arith.constant 0 : index
    %291 = vector.load %arg1[%c6_100, %c0_101, %c0_102] : memref<8x8x128xf32, #tpu.memory_space<vmem>>, vector<1x8x128xf32>
    %292 = vector.shape_cast %291 : vector<1x8x128xf32> to vector<8x128xf32>
    %cst_103 = arith.constant dense<0.000000e+00> : vector<8x128xf32>
    %293 = tpu.matmul %264, %3, %cst_103 {dimension_numbers = #tpu.dot_dimension_numbers<[1], [0], [0], [1], [0, 0, 1, 1], [], []>} : vector<8x32xf32>, vector<32x128xf32>, vector<8x128xf32> -> vector<8x128xf32>
    %294 = arith.addf %292, %293 : vector<8x128xf32>
    %295 = math.tanh %294 : vector<8x128xf32>
    %296 = arith.negf %294 : vector<8x128xf32>
    %297 = math.exp %296 : vector<8x128xf32>
    %cst_104 = arith.constant 1.000000e+00 : f32
    %298 = vector.broadcast %cst_104 : f32 to vector<8x128xf32>
    %299 = arith.addf %298, %297 : vector<8x128xf32>
    %300 = arith.divf %298, %299 : vector<8x128xf32>
    %301 = arith.select %10, %295, %300 : vector<8x128xi1>, vector<8x128xf32>
    %302 = vector.extract_strided_slice %301 {offsets = [0, 0], sizes = [8, 32], strides = [1, 1]} : vector<8x128xf32> to vector<8x32xf32>
    %303 = vector.extract_strided_slice %301 {offsets = [0, 32], sizes = [8, 32], strides = [1, 1]} : vector<8x128xf32> to vector<8x32xf32>
    %304 = vector.extract_strided_slice %301 {offsets = [0, 64], sizes = [8, 32], strides = [1, 1]} : vector<8x128xf32> to vector<8x32xf32>
    %305 = vector.extract_strided_slice %301 {offsets = [0, 96], sizes = [8, 32], strides = [1, 1]} : vector<8x128xf32> to vector<8x32xf32>
    %306 = arith.mulf %303, %262 : vector<8x32xf32>
    %307 = arith.mulf %302, %304 : vector<8x32xf32>
    %308 = arith.addf %306, %307 : vector<8x32xf32>
    %309 = math.tanh %308 : vector<8x32xf32>
    %310 = arith.mulf %305, %309 : vector<8x32xf32>
    %c6_105 = arith.constant 6 : index
    %c0_106 = arith.constant 0 : index
    %c0_107 = arith.constant 0 : index
    %311 = vector.load %arg5[%c6_105, %c0_106, %c0_107] : memref<8x8x32xf32, #tpu.memory_space<vmem>>, vector<1x8x32xf32>
    %312 = vector.shape_cast %311 : vector<1x8x32xf32> to vector<8x32xf32>
    %313 = vector.shape_cast %310 : vector<8x32xf32> to vector<1x8x32xf32>
    tpu.vector_store %arg5[%c6_105, %c0_106, %c0_107], %313 {strides = array<i32>} : memref<8x8x32xf32, #tpu.memory_space<vmem>>, vector<1x8x32xf32>,
    %c1_108 = arith.constant 1 : index
    %c0_109 = arith.constant 0 : index
    %c0_110 = arith.constant 0 : index
    %314 = vector.load %arg2[%c1_108, %c0_109, %c0_110] : memref<8x8x128xf32, #tpu.memory_space<vmem>>, vector<1x8x128xf32>
    %315 = vector.shape_cast %314 : vector<1x8x128xf32> to vector<8x128xf32>
    %cst_111 = arith.constant dense<0.000000e+00> : vector<8x128xf32>
    %316 = tpu.matmul %287, %4, %cst_111 {dimension_numbers = #tpu.dot_dimension_numbers<[1], [0], [0], [1], [0, 0, 1, 1], [], []>} : vector<8x32xf32>, vector<32x128xf32>, vector<8x128xf32> -> vector<8x128xf32>
    %317 = arith.addf %315, %316 : vector<8x128xf32>
    %318 = math.tanh %317 : vector<8x128xf32>
    %319 = arith.negf %317 : vector<8x128xf32>
    %320 = math.exp %319 : vector<8x128xf32>
    %cst_112 = arith.constant 1.000000e+00 : f32
    %321 = vector.broadcast %cst_112 : f32 to vector<8x128xf32>
    %322 = arith.addf %321, %320 : vector<8x128xf32>
    %323 = arith.divf %321, %322 : vector<8x128xf32>
    %324 = arith.select %10, %318, %323 : vector<8x128xi1>, vector<8x128xf32>
    %325 = vector.extract_strided_slice %324 {offsets = [0, 0], sizes = [8, 32], strides = [1, 1]} : vector<8x128xf32> to vector<8x32xf32>
    %326 = vector.extract_strided_slice %324 {offsets = [0, 32], sizes = [8, 32], strides = [1, 1]} : vector<8x128xf32> to vector<8x32xf32>
    %327 = vector.extract_strided_slice %324 {offsets = [0, 64], sizes = [8, 32], strides = [1, 1]} : vector<8x128xf32> to vector<8x32xf32>
    %328 = vector.extract_strided_slice %324 {offsets = [0, 96], sizes = [8, 32], strides = [1, 1]} : vector<8x128xf32> to vector<8x32xf32>
    %329 = arith.mulf %326, %285 : vector<8x32xf32>
    %330 = arith.mulf %325, %327 : vector<8x32xf32>
    %331 = arith.addf %329, %330 : vector<8x32xf32>
    %332 = math.tanh %331 : vector<8x32xf32>
    %333 = arith.mulf %328, %332 : vector<8x32xf32>
    %c1_113 = arith.constant 1 : index
    %c0_114 = arith.constant 0 : index
    %c0_115 = arith.constant 0 : index
    %334 = vector.load %arg6[%c1_113, %c0_114, %c0_115] : memref<8x8x32xf32, #tpu.memory_space<vmem>>, vector<1x8x32xf32>
    %335 = vector.shape_cast %334 : vector<1x8x32xf32> to vector<8x32xf32>
    %336 = vector.shape_cast %333 : vector<8x32xf32> to vector<1x8x32xf32>
    tpu.vector_store %arg6[%c1_113, %c0_114, %c0_115], %336 {strides = array<i32>} : memref<8x8x32xf32, #tpu.memory_space<vmem>>, vector<1x8x32xf32>,
    %c7_116 = arith.constant 7 : index
    %c0_117 = arith.constant 0 : index
    %c0_118 = arith.constant 0 : index
    %337 = vector.load %arg1[%c7_116, %c0_117, %c0_118] : memref<8x8x128xf32, #tpu.memory_space<vmem>>, vector<1x8x128xf32>
    %338 = vector.shape_cast %337 : vector<1x8x128xf32> to vector<8x128xf32>
    %cst_119 = arith.constant dense<0.000000e+00> : vector<8x128xf32>
    %339 = tpu.matmul %310, %3, %cst_119 {dimension_numbers = #tpu.dot_dimension_numbers<[1], [0], [0], [1], [0, 0, 1, 1], [], []>} : vector<8x32xf32>, vector<32x128xf32>, vector<8x128xf32> -> vector<8x128xf32>
    %340 = arith.addf %338, %339 : vector<8x128xf32>
    %341 = math.tanh %340 : vector<8x128xf32>
    %342 = arith.negf %340 : vector<8x128xf32>
    %343 = math.exp %342 : vector<8x128xf32>
    %cst_120 = arith.constant 1.000000e+00 : f32
    %344 = vector.broadcast %cst_120 : f32 to vector<8x128xf32>
    %345 = arith.addf %344, %343 : vector<8x128xf32>
    %346 = arith.divf %344, %345 : vector<8x128xf32>
    %347 = arith.select %10, %341, %346 : vector<8x128xi1>, vector<8x128xf32>
    %348 = vector.extract_strided_slice %347 {offsets = [0, 0], sizes = [8, 32], strides = [1, 1]} : vector<8x128xf32> to vector<8x32xf32>
    %349 = vector.extract_strided_slice %347 {offsets = [0, 32], sizes = [8, 32], strides = [1, 1]} : vector<8x128xf32> to vector<8x32xf32>
    %350 = vector.extract_strided_slice %347 {offsets = [0, 64], sizes = [8, 32], strides = [1, 1]} : vector<8x128xf32> to vector<8x32xf32>
    %351 = vector.extract_strided_slice %347 {offsets = [0, 96], sizes = [8, 32], strides = [1, 1]} : vector<8x128xf32> to vector<8x32xf32>
    %352 = arith.mulf %349, %308 : vector<8x32xf32>
    %353 = arith.mulf %348, %350 : vector<8x32xf32>
    %354 = arith.addf %352, %353 : vector<8x32xf32>
    %355 = math.tanh %354 : vector<8x32xf32>
    %356 = arith.mulf %351, %355 : vector<8x32xf32>
    %c7_121 = arith.constant 7 : index
    %c0_122 = arith.constant 0 : index
    %c0_123 = arith.constant 0 : index
    %357 = vector.load %arg5[%c7_121, %c0_122, %c0_123] : memref<8x8x32xf32, #tpu.memory_space<vmem>>, vector<1x8x32xf32>
    %358 = vector.shape_cast %357 : vector<1x8x32xf32> to vector<8x32xf32>
    %359 = vector.shape_cast %356 : vector<8x32xf32> to vector<1x8x32xf32>
    tpu.vector_store %arg5[%c7_121, %c0_122, %c0_123], %359 {strides = array<i32>} : memref<8x8x32xf32, #tpu.memory_space<vmem>>, vector<1x8x32xf32>,
    %c0_124 = arith.constant 0 : index
    %c0_125 = arith.constant 0 : index
    %c0_126 = arith.constant 0 : index
    %360 = vector.load %arg2[%c0_124, %c0_125, %c0_126] : memref<8x8x128xf32, #tpu.memory_space<vmem>>, vector<1x8x128xf32>
    %361 = vector.shape_cast %360 : vector<1x8x128xf32> to vector<8x128xf32>
    %cst_127 = arith.constant dense<0.000000e+00> : vector<8x128xf32>
    %362 = tpu.matmul %333, %4, %cst_127 {dimension_numbers = #tpu.dot_dimension_numbers<[1], [0], [0], [1], [0, 0, 1, 1], [], []>} : vector<8x32xf32>, vector<32x128xf32>, vector<8x128xf32> -> vector<8x128xf32>
    %363 = arith.addf %361, %362 : vector<8x128xf32>
    %364 = math.tanh %363 : vector<8x128xf32>
    %365 = arith.negf %363 : vector<8x128xf32>
    %366 = math.exp %365 : vector<8x128xf32>
    %cst_128 = arith.constant 1.000000e+00 : f32
    %367 = vector.broadcast %cst_128 : f32 to vector<8x128xf32>
    %368 = arith.addf %367, %366 : vector<8x128xf32>
    %369 = arith.divf %367, %368 : vector<8x128xf32>
    %370 = arith.select %10, %364, %369 : vector<8x128xi1>, vector<8x128xf32>
    %371 = vector.extract_strided_slice %370 {offsets = [0, 0], sizes = [8, 32], strides = [1, 1]} : vector<8x128xf32> to vector<8x32xf32>
    %372 = vector.extract_strided_slice %370 {offsets = [0, 32], sizes = [8, 32], strides = [1, 1]} : vector<8x128xf32> to vector<8x32xf32>
    %373 = vector.extract_strided_slice %370 {offsets = [0, 64], sizes = [8, 32], strides = [1, 1]} : vector<8x128xf32> to vector<8x32xf32>
    %374 = vector.extract_strided_slice %370 {offsets = [0, 96], sizes = [8, 32], strides = [1, 1]} : vector<8x128xf32> to vector<8x32xf32>
    %375 = arith.mulf %372, %331 : vector<8x32xf32>
    %376 = arith.mulf %371, %373 : vector<8x32xf32>
    %377 = arith.addf %375, %376 : vector<8x32xf32>
    %378 = math.tanh %377 : vector<8x32xf32>
    %379 = arith.mulf %374, %378 : vector<8x32xf32>
    %c0_129 = arith.constant 0 : index
    %c0_130 = arith.constant 0 : index
    %c0_131 = arith.constant 0 : index
    %380 = vector.load %arg6[%c0_129, %c0_130, %c0_131] : memref<8x8x32xf32, #tpu.memory_space<vmem>>, vector<1x8x32xf32>
    %381 = vector.shape_cast %380 : vector<1x8x32xf32> to vector<8x32xf32>
    %382 = vector.shape_cast %379 : vector<8x32xf32> to vector<1x8x32xf32>
    tpu.vector_store %arg6[%c0_129, %c0_130, %c0_131], %382 {strides = array<i32>} : memref<8x8x32xf32, #tpu.memory_space<vmem>>, vector<1x8x32xf32>,
    %c0_132 = arith.constant 0 : index
    %c0_133 = arith.constant 0 : index
    %383 = vector.load %arg7[%c0_132, %c0_133] : memref<8x32xf32, #tpu.memory_space<vmem>>, vector<8x32xf32>
    tpu.vector_store %arg7[%c0_132, %c0_133], %356 {strides = array<i32>} : memref<8x32xf32, #tpu.memory_space<vmem>>, vector<8x32xf32>,
    %c0_134 = arith.constant 0 : index
    %c0_135 = arith.constant 0 : index
    %384 = vector.load %arg8[%c0_134, %c0_135] : memref<8x32xf32, #tpu.memory_space<vmem>>, vector<8x32xf32>
    tpu.vector_store %arg8[%c0_134, %c0_135], %354 {strides = array<i32>} : memref<8x32xf32, #tpu.memory_space<vmem>>, vector<8x32xf32>,
    %c0_136 = arith.constant 0 : index
    %c0_137 = arith.constant 0 : index
    %385 = vector.load %arg9[%c0_136, %c0_137] : memref<8x32xf32, #tpu.memory_space<vmem>>, vector<8x32xf32>
    tpu.vector_store %arg9[%c0_136, %c0_137], %379 {strides = array<i32>} : memref<8x32xf32, #tpu.memory_space<vmem>>, vector<8x32xf32>,
    %c0_138 = arith.constant 0 : index
    %c0_139 = arith.constant 0 : index
    %386 = vector.load %arg10[%c0_138, %c0_139] : memref<8x32xf32, #tpu.memory_space<vmem>>, vector<8x32xf32>
    tpu.vector_store %arg10[%c0_138, %c0_139], %377 {strides = array<i32>} : memref<8x32xf32, #tpu.memory_space<vmem>>, vector<8x32xf32>,
    return
  }
  func.func @transform_0(%arg0: i32) -> (i32, i32, i32) {
    %c0_i32 = arith.constant 0 : i32
    %c0_i32_0 = arith.constant 0 : i32
    %c0_i32_1 = arith.constant 0 : i32
    return %arg0, %c0_i32, %c0_i32_0 : i32, i32, i32
  }
  func.func @transform_1(%arg0: i32) -> (i32, i32, i32) {
    %c0_i32 = arith.constant 0 : i32
    %0 = arith.subi %c0_i32, %arg0 : i32
    %c0_i32_0 = arith.constant 0 : i32
    %c0_i32_1 = arith.constant 0 : i32
    %c0_i32_2 = arith.constant 0 : i32
    return %0, %c0_i32_0, %c0_i32_1 : i32, i32, i32
  }
  func.func @transform_4(%arg0: i32) -> (i32, i32, i32) {
    %c0_i32 = arith.constant 0 : i32
    %c0_i32_0 = arith.constant 0 : i32
    %c0_i32_1 = arith.constant 0 : i32
    return %arg0, %c0_i32, %c0_i32_0 : i32, i32, i32
  }
  func.func @transform_5(%arg0: i32) -> (i32, i32, i32) {
    %c0_i32 = arith.constant 0 : i32
    %0 = arith.subi %c0_i32, %arg0 : i32
    %c0_i32_0 = arith.constant 0 : i32
    %c0_i32_1 = arith.constant 0 : i32
    %c0_i32_2 = arith.constant 0 : i32
    return %0, %c0_i32_0, %c0_i32_1 : i32, i32, i32
  }
}

</mosaic_0001>

<bundles_post_ra>
// kernel: bilstm_forward.1
= control target key start
LH: loop header
LB: loop body
LE: loop exit
PB: predicated region body
PF: predicated region fallthrough
CT: control target
= control target key end

     0   :  { %s2965_s0 = inlined_call_operand.vmem [shape: f32[8,8,128], index: 0, kind: input, shape index: {}]   ;;  %s2966_s1 = inlined_call_operand.vmem [shape: f32[8,8,128], index: 1, kind: input, shape index: {}]   ;;  %s2967_s2 = inlined_call_operand.vmem [shape: f32[32,128], index: 2, kind: input, shape index: {}]   ;;  %s2968_s3 = inlined_call_operand.vmem [shape: f32[32,128], index: 3, kind: input, shape index: {}]   ;;  %s2969_s4 = inlined_call_operand.vmem [shape: f32[8,8,32], index: 4, kind: output, shape index: {0}]   ;;  %s2970_s5 = inlined_call_operand.vmem [shape: f32[8,8,32], index: 5, kind: output, shape index: {1}]  }
   0x1   :  { %v87_v0 = vld [vmem:[%s2967_s2] sm:$0xff]  ;;  %v89_v1 = vld [vmem:[%s2967_s2 + $0x8] sm:$0xff]  ;;  %v91_v2 = vld [vmem:[%s2967_s2 + $0x10] sm:$0xff] }
   0x2   :  { %v93_v3 = vld [vmem:[%s2967_s2 + $0x18] sm:$0xff] }
   0x3   :  { %102 = vsyncadd [#allocation8], 512  ;;  %v136_v4 = vld [vmem:[%s2968_s3] sm:$0xff]  ;;  %v138_v5 = vld [vmem:[%s2968_s3 + $0x8] sm:$0xff] }
   0x4   :  { %v140_v6 = vld [vmem:[%s2968_s3 + $0x10] sm:$0xff]  ;;  %v142_v7 = vld [vmem:[%s2968_s3 + $0x18] sm:$0xff] }
   0x5   :  { %151 = vsyncadd [#allocation8 + $0x1], 512  ;;  %vm152_vm0 = vcmask 261120   ;;  %v2511_v8 = vmov 0.0  }
   0x6   :  { %153 = vst.msk [vmem:[#allocation2] sm:$0xff] %vm152_vm0, %v2511_v8  ;;  %154 = vst.msk [vmem:[#allocation3] sm:$0xff] %vm152_vm0, %v2511_v8 }
   0x7   :  { %155 = vst.msk [vmem:[#allocation4] sm:$0xff] %vm152_vm0, %v2511_v8  ;;  %156 = vst.msk [vmem:[#allocation5] sm:$0xff] %vm152_vm0, %v2511_v8 }
   0x8   :  { %2507 = dma.done.wait [#allocation8], 512 }
   0x9   :  { %2508 = vsyncadd [#allocation8], 4294966784 }
   0xa   :  { %2509 = dma.done.wait [#allocation8 + $0x1], 512 }
   0xb   :  { %2510 = vsyncadd [#allocation8 + $0x1], 4294966784  ;;  %v2579_v9 = vpack.c.bf16 %v89_v1, %v87_v0  ;;  %v2581_v10 = vpack.c.bf16 %v138_v5, %v136_v4  ;;  %v2512_v11 = vmov 0.0|0.0   ;;  %v2587_v12 = vpack.c.bf16 %v93_v3, %v91_v2  ;;  %s2514_s2 = smov 32   ;;  %v179_v18 = vld [vmem:[%s2965_s0] sm:$0xff]  ;;  %v1961_v19 = vld [vmem:[%s2966_s1 + $0x38] sm:$0xff] }
   0xc   :  { %2277 = vmatprep.subr.bf16.mxu0 %v2512_v11  ;;  %2283 = vmatprep.subr.bf16.mxu1 %v2512_v11  ;;  %v2589_v13 = vpack.c.bf16 %v142_v7, %v140_v6  ;;  %vm2513_vm1 = vmmov 0   ;;  %v170_v29 = vlaneseq  ;;  %s2515_s12 = smov 64   ;;  %v1965_v61 = vld [vmem:[%s2965_s0 + $0x8] sm:$0xff]  ;;  %v1969_v1 = vld [vmem:[%s2966_s1 + $0x30] sm:$0xff] }
   0xd   :  { %2279 = vmatpush3.bf16.msra.mxu0 %v2579_v9  ;;  %2285 = vmatpush3.bf16.msra.mxu1 %v2581_v10  ;;  %v175_v14 = vld [vmem:[#allocation2] sm:$0xff]  ;;  %v176_v16 = vld [vmem:[#allocation3] sm:$0xff] }
   0xe   :  { %2280 = vmatprep.subr.bf16.mxu0 %v2512_v11  ;;  %2286 = vmatprep.subr.bf16.mxu1 %v2512_v11  ;;  %v177_v15 = vld [vmem:[#allocation4] sm:$0xff]  ;;  %v178_v17 = vld [vmem:[#allocation5] sm:$0xff]  ;;  %v171_v33 = vand.u32 127, %v170_v29 }
   0xf   :  { %2109 = vmatprep.mubr.msk.f32.mxu0 %vm2513_vm1, %v2511_v8  ;;  %2120 = vmatprep.mubr.msk.f32.mxu1 %vm2513_vm1, %v2511_v8 }
  0x10   :  { %264 = vrot.lane.b32.xlu1 %v176_v16, %s2514_s2  ;;  %vm172_vm2 = vcmp.ge.s32.totalorder %v171_v33, 64  ;;  %vm173_vm3 = vcmp.lt.s32.totalorder %v171_v33, 96 }
  0x11   :  { %2282 = vmatpush3.bf16.msra.mxu0 %v2587_v12  ;;  %2288 = vmatpush3.bf16.msra.mxu1 %v2589_v13  ;;  %vm2623_vm4 = vmand %vm172_vm2, %vm173_vm3 }
  0x12   :  { %2289 = vmatprep.subr.bf16.mxu0 %v2512_v11  ;;  %2295 = vmatprep.subr.bf16.mxu1 %v2512_v11 }
  0x14   :  { %2110 = vmatmul.mubr.msk.f32.vlgmr.msra.gmra.mrb[0].mxu0 %vm152_vm0, %v175_v14  ;;  %2121 = vmatmul.mubr.msk.f32.vlgmr.msra.gmra.mrb[0].mxu1 %vm152_vm0, %v177_v15 }
  0x15   :  { %2291 = vmatpush3.bf16.msra.mxu0 %v2579_v9  ;;  %2297 = vmatpush3.bf16.msra.mxu1 %v2581_v10 }
  0x16   :  { %2292 = vmatprep.subr.bf16.mxu0 %v2512_v11  ;;  %2131 = vmatprep.mubr.msk.f32.mxu0 %vm2513_vm1, %v2511_v8 }
  0x17   :  { %374 = vrot.lane.b32.xlu1 %v178_v17, %s2514_s2  ;;  %2298 = vmatprep.subr.bf16.mxu1 %v2512_v11 }
  0x18   :  { %2142 = vmatprep.mubr.msk.f32.mxu1 %vm2513_vm1, %v2511_v8 }
  0x19   :  { %2294 = vmatpush3.bf16.msra.mxu0 %v2587_v12  ;;  %2300 = vmatpush3.bf16.msra.mxu1 %v2589_v13 }
  0x1a   :  { %2301 = vmatprep.subr.bf16.mxu0 %v2512_v11  ;;  %2307 = vmatprep.subr.bf16.mxu1 %v2512_v11 }
  0x82   :  { %v265_v45 = vpop.permute.xlu1 %264 }
  0x89   :  { %v375_v47 = vpop.permute.xlu1 %374 }
  0xe7   :  { %v250_v20 = vpop.f32.mrb[0].mxu0  ;;  %v360_v21 = vpop.f32.mrb[0].mxu1 }
  0xe8   :  { %v254_v22 = vadd.f32 %v250_v20, %v179_v18  ;;  %v364_v23 = vadd.f32 %v1961_v19, %v360_v21  ;;  %v2111_v24 = vpop.f32.mrb[1].mxu0  ;;  %v2122_v25 = vpop.f32.mrb[1].mxu1 }
  0xea   :  { %v1960_v26 = vmul.f32 -1.442695, %v254_v22  ;;  %v1963_v27 = vmul.f32 -1.442695, %v364_v23 }
  0xec   :  { %2379 = vpow2.f32 %v1960_v26 }
  0xed   :  { %2381 = vpow2.f32 %v1963_v27 }
  0xee   :  { %2383 = vtanh.f32 %v254_v22 }
  0xf6   :  { %v2380_v28 = vpop.eup %2379 }
  0xf7   :  { %v2382_v30 = vpop.eup %2381  ;;  %v259_v31 = vadd.f32 1.0, %v2380_v28 }
  0xf8   :  { %v369_v32 = vadd.f32 1.0, %v2382_v30  ;;  %v2384_v35 = vpop.eup %2383 }
  0xf9   :  { %2385 = vrcp.f32 %v259_v31 }
  0xfa   :  { %2387 = vrcp.f32 %v369_v32 }
  0xfb   :  { %2389 = vtanh.f32 %v364_v23 }
 0x103   :  { %v2386_v36 = vpop.eup %2385 }
 0x104   :  { %v262_v37 = vsel %vm2623_vm4, %v2384_v35, %v2386_v36  ;;  %v2388_v38 = vpop.eup %2387 }
 0x105   :  { %269 = vrot.lane.b32.xlu0 %v262_v37, %s2515_s12  ;;  %v2390_v39 = vpop.eup %2389  ;;  %v267_v46 = vmul.f32 %v265_v45, %v262_v37 }
 0x106   :  { %v372_v40 = vsel %vm2623_vm4, %v2390_v39, %v2388_v38 }
 0x107   :  { %v377_v50 = vmul.f32 %v375_v47, %v372_v40 }
 0x109   :  { %379 = vrot.lane.b32.xlu0 %v372_v40, %s2515_s12 }
 0x177   :  { %v270_v41 = vpop.permute.xlu0 %269 }
 0x178   :  { %v272_v42 = vmul.f32 %v270_v41, %v262_v37 }
 0x17a   :  { %274 = vrot.lane.b32.xlu0 %v272_v42, %s2514_s2  ;;  %v1973_v42 = vld [vmem:[%s2965_s0 + $0x10] sm:$0xff] }
 0x17b   :  { %v380_v43 = vpop.permute.xlu0 %379 }
 0x17c   :  { %v382_v44 = vmul.f32 %v380_v43, %v372_v40 }
 0x17e   :  { %384 = vrot.lane.b32.xlu1 %v382_v44, %s2514_s2 }
 0x1ec   :  { %v275_v48 = vpop.permute.xlu0 %274 }
 0x1ed   :  { %v2635_v49 = vadd.f32 %v275_v48, %v267_v46  ;;  %v1977_v46 = vld [vmem:[%s2966_s1 + $0x28] sm:$0xff] }
 0x1ef   :  { %2391 = vtanh.f32 %v2635_v49 }
 0x1f0   :  { %v385_v51 = vpop.permute.xlu1 %384 }
 0x1f1   :  { %v2638_v52 = vadd.f32 %v385_v51, %v377_v50 }
 0x1f3   :  { %2393 = vtanh.f32 %v2638_v52 }
 0x1f9   :  { %v2392_v53 = vpop.eup %2391 }
 0x1fa   :  { %280 = vrot.lane.b32.xlu0 %v2392_v53, %s2515_s12 }
 0x1fd   :  { %v2394_v54 = vpop.eup %2393 }
 0x1fe   :  { %390 = vrot.lane.b32.xlu1 %v2394_v54, %s2515_s12 }
 0x26c   :  { %v281_v55 = vpop.permute.xlu0 %280 }
 0x26d   :  { %v283_v56 = vmul.f32 %v281_v55, %v262_v37 }
 0x26f   :  { %285 = vrot.lane.b32.xlu0 %v283_v56, %s2514_s2 }
 0x270   :  { %v391_v57 = vpop.permute.xlu1 %390 }
 0x271   :  { %v393_v58 = vmul.f32 %v391_v57, %v372_v40 }
 0x273   :  { %395 = vrot.lane.b32.xlu1 %v393_v58, %s2514_s2 }
 0x2e1   :  { %v286_v59 = vpop.permute.xlu0 %285 }
 0x2e2   :  { %288 = vst.msk [vmem:[%s2969_s4] sm:$0xff] %vm152_vm0, %v286_v59  ;;  %2132 = vmatmul.mubr.msk.f32.vlgmr.msra.gmra.mrb[2].mxu0 %vm152_vm0, %v286_v59 }
 0x2e3   :  { %2303 = vmatpush3.bf16.msra.mxu0 %v2579_v9  ;;  %2153 = vmatprep.mubr.msk.f32.mxu0 %vm2513_vm1, %v2511_v8 }
 0x2e4   :  { %2304 = vmatprep.subr.bf16.mxu0 %v2512_v11 }
 0x2e5   :  { %v396_v60 = vpop.permute.xlu1 %395 }
 0x2e6   :  { %1964 = vst.msk [vmem:[%s2970_s5 + $0x38] sm:$0xff] %vm152_vm0, %v396_v60  ;;  %2143 = vmatmul.mubr.msk.f32.vlgmr.msra.gmra.mrb[2].mxu1 %vm152_vm0, %v396_v60 }
 0x2e7   :  { %2306 = vmatpush3.bf16.msra.mxu0 %v2587_v12  ;;  %2309 = vmatpush3.bf16.msra.mxu1 %v2581_v10 }
 0x2e8   :  { %2310 = vmatprep.subr.bf16.mxu1 %v2512_v11  ;;  %2164 = vmatprep.mubr.msk.f32.mxu1 %vm2513_vm1, %v2511_v8 }
 0x2e9   :  { %2313 = vmatprep.subr.bf16.mxu0 %v2512_v11 }
 0x2eb   :  { %2312 = vmatpush3.bf16.msra.mxu1 %v2589_v13 }
 0x2ec   :  { %2319 = vmatprep.subr.bf16.mxu1 %v2512_v11 }
 0x3b5   :  { %v470_v62 = vpop.f32.mrb[2].mxu0 }
 0x3b6   :  { %v474_v63 = vadd.f32 %v1965_v61, %v470_v62  ;;  %v2133_v0 = vpop.f32.mrb[3].mxu0 }
 0x3b8   :  { %v1967_v2 = vmul.f32 -1.442695, %v474_v63 }
 0x3b9   :  { %v576_v3 = vpop.f32.mrb[2].mxu1 }
 0x3ba   :  { %2395 = vpow2.f32 %v1967_v2  ;;  %v580_v4 = vadd.f32 %v1969_v1, %v576_v3  ;;  %v2144_v5 = vpop.f32.mrb[3].mxu1 }
 0x3bc   :  { %v1971_v6 = vmul.f32 -1.442695, %v580_v4 }
 0x3be   :  { %2397 = vpow2.f32 %v1971_v6 }
 0x3bf   :  { %2399 = vtanh.f32 %v474_v63 }
 0x3c4   :  { %v2396_v7 = vpop.eup %2395 }
 0x3c5   :  { %v479_v14 = vadd.f32 1.0, %v2396_v7 }
 0x3c7   :  { %2401 = vrcp.f32 %v479_v14 }
 0x3c8   :  { %v2398_v15 = vpop.eup %2397  ;;  %2403 = vtanh.f32 %v580_v4 }
 0x3c9   :  { %v585_v16 = vadd.f32 1.0, %v2398_v15  ;;  %v2400_v17 = vpop.eup %2399 }
 0x3cb   :  { %2405 = vrcp.f32 %v585_v16 }
 0x3d1   :  { %v2402_v18 = vpop.eup %2401 }
 0x3d2   :  { %v482_v19 = vsel %vm2623_vm4, %v2400_v17, %v2402_v18  ;;  %v2404_v20 = vpop.eup %2403 }
 0x3d3   :  { %485 = vrot.lane.b32.xlu0 %v482_v19, %s2515_s12  ;;  %v483_v27 = vmul.f32 %v482_v19, %v2635_v49 }
 0x3d5   :  { %v2406_v21 = vpop.eup %2405 }
 0x3d6   :  { %v588_v22 = vsel %vm2623_vm4, %v2404_v20, %v2406_v21 }
 0x3d7   :  { %591 = vrot.lane.b32.xlu1 %v588_v22, %s2515_s12  ;;  %v589_v30 = vmul.f32 %v588_v22, %v2638_v52 }
 0x445   :  { %v486_v23 = vpop.permute.xlu0 %485 }
 0x446   :  { %v488_v24 = vmul.f32 %v486_v23, %v482_v19 }
 0x448   :  { %490 = vrot.lane.b32.xlu0 %v488_v24, %s2514_s2 }
 0x449   :  { %v592_v25 = vpop.permute.xlu1 %591 }
 0x44a   :  { %v594_v26 = vmul.f32 %v592_v25, %v588_v22 }
 0x44c   :  { %596 = vrot.lane.b32.xlu1 %v594_v26, %s2514_s2  ;;  %v1985_v26 = vld [vmem:[%s2966_s1 + $0x20] sm:$0xff] }
 0x4ba   :  { %v491_v28 = vpop.permute.xlu0 %490 }
 0x4bb   :  { %v2682_v29 = vadd.f32 %v491_v28, %v483_v27 }
 0x4bd   :  { %2407 = vtanh.f32 %v2682_v29 }
 0x4be   :  { %v597_v31 = vpop.permute.xlu1 %596 }
 0x4bf   :  { %v2686_v32 = vadd.f32 %v597_v31, %v589_v30 }
 0x4c1   :  { %2409 = vtanh.f32 %v2686_v32 }
 0x4c7   :  { %v2408_v33 = vpop.eup %2407 }
 0x4c8   :  { %496 = vrot.lane.b32.xlu0 %v2408_v33, %s2515_s12 }
 0x4cb   :  { %v2410_v35 = vpop.eup %2409 }
 0x4cc   :  { %602 = vrot.lane.b32.xlu1 %v2410_v35, %s2515_s12 }
 0x53a   :  { %v497_v36 = vpop.permute.xlu0 %496 }
 0x53b   :  { %v499_v37 = vmul.f32 %v497_v36, %v482_v19 }
 0x53d   :  { %501 = vrot.lane.b32.xlu0 %v499_v37, %s2514_s2 }
 0x53e   :  { %v603_v38 = vpop.permute.xlu1 %602 }
 0x53f   :  { %v605_v39 = vmul.f32 %v603_v38, %v588_v22  ;;  %v1981_v22 = vld [vmem:[%s2965_s0 + $0x18] sm:$0xff] }
 0x541   :  { %607 = vrot.lane.b32.xlu1 %v605_v39, %s2514_s2 }
 0x5af   :  { %v502_v40 = vpop.permute.xlu0 %501 }
 0x5b0   :  { %1968 = vst.msk [vmem:[%s2969_s4 + $0x8] sm:$0xff] %vm152_vm0, %v502_v40  ;;  %2154 = vmatmul.mubr.msk.f32.vlgmr.msra.gmra.mrb[4].mxu0 %vm152_vm0, %v502_v40 }
 0x5b1   :  { %2315 = vmatpush3.bf16.msra.mxu0 %v2579_v9  ;;  %2175 = vmatprep.mubr.msk.f32.mxu0 %vm2513_vm1, %v2511_v8 }
 0x5b2   :  { %2316 = vmatprep.subr.bf16.mxu0 %v2512_v11 }
 0x5b3   :  { %v608_v41 = vpop.permute.xlu1 %607 }
 0x5b4   :  { %1972 = vst.msk [vmem:[%s2970_s5 + $0x30] sm:$0xff] %vm152_vm0, %v608_v41  ;;  %2165 = vmatmul.mubr.msk.f32.vlgmr.msra.gmra.mrb[4].mxu1 %vm152_vm0, %v608_v41 }
 0x5b5   :  { %2318 = vmatpush3.bf16.msra.mxu0 %v2587_v12  ;;  %2321 = vmatpush3.bf16.msra.mxu1 %v2581_v10 }
 0x5b6   :  { %2322 = vmatprep.subr.bf16.mxu1 %v2512_v11  ;;  %2186 = vmatprep.mubr.msk.f32.mxu1 %vm2513_vm1, %v2511_v8 }
 0x5b7   :  { %2325 = vmatprep.subr.bf16.mxu0 %v2512_v11 }
 0x5b9   :  { %2324 = vmatpush3.bf16.msra.mxu1 %v2589_v13 }
 0x5ba   :  { %2331 = vmatprep.subr.bf16.mxu1 %v2512_v11 }
 0x683   :  { %v682_v43 = vpop.f32.mrb[4].mxu0 }
 0x684   :  { %v686_v44 = vadd.f32 %v1973_v42, %v682_v43  ;;  %v2155_v45 = vpop.f32.mrb[5].mxu0 }
 0x686   :  { %v1975_v47 = vmul.f32 -1.442695, %v686_v44 }
 0x687   :  { %v788_v48 = vpop.f32.mrb[4].mxu1 }
 0x688   :  { %2411 = vpow2.f32 %v1975_v47  ;;  %v792_v49 = vadd.f32 %v1977_v46, %v788_v48  ;;  %v2166_v50 = vpop.f32.mrb[5].mxu1 }
 0x68a   :  { %v1979_v51 = vmul.f32 -1.442695, %v792_v49 }
 0x68c   :  { %2413 = vpow2.f32 %v1979_v51 }
 0x68d   :  { %2415 = vtanh.f32 %v686_v44 }
 0x692   :  { %v2412_v52 = vpop.eup %2411 }
 0x693   :  { %v691_v53 = vadd.f32 1.0, %v2412_v52 }
 0x695   :  { %2417 = vrcp.f32 %v691_v53 }
 0x696   :  { %v2414_v54 = vpop.eup %2413  ;;  %2419 = vtanh.f32 %v792_v49 }
 0x697   :  { %v797_v55 = vadd.f32 1.0, %v2414_v54  ;;  %v2416_v56 = vpop.eup %2415 }
 0x699   :  { %2421 = vrcp.f32 %v797_v55 }
 0x69f   :  { %v2418_v57 = vpop.eup %2417 }
 0x6a0   :  { %v694_v58 = vsel %vm2623_vm4, %v2416_v56, %v2418_v57  ;;  %v2420_v59 = vpop.eup %2419 }
 0x6a1   :  { %697 = vrot.lane.b32.xlu0 %v694_v58, %s2515_s12  ;;  %v695_v2 = vmul.f32 %v694_v58, %v2682_v29 }
 0x6a3   :  { %v2422_v60 = vpop.eup %2421 }
 0x6a4   :  { %v800_v61 = vsel %vm2623_vm4, %v2420_v59, %v2422_v60 }
 0x6a5   :  { %803 = vrot.lane.b32.xlu1 %v800_v61, %s2515_s12  ;;  %v801_v5 = vmul.f32 %v800_v61, %v2686_v32 }
 0x713   :  { %v698_v62 = vpop.permute.xlu0 %697 }
 0x714   :  { %v700_v63 = vmul.f32 %v698_v62, %v694_v58 }
 0x716   :  { %702 = vrot.lane.b32.xlu0 %v700_v63, %s2514_s2 }
 0x717   :  { %v804_v0 = vpop.permute.xlu1 %803 }
 0x718   :  { %v806_v1 = vmul.f32 %v804_v0, %v800_v61 }
 0x71a   :  { %808 = vrot.lane.b32.xlu1 %v806_v1, %s2514_s2  ;;  %v1993_v1 = vld [vmem:[%s2966_s1 + $0x18] sm:$0xff] }
 0x788   :  { %v703_v3 = vpop.permute.xlu0 %702 }
 0x789   :  { %v2730_v4 = vadd.f32 %v703_v3, %v695_v2 }
 0x78b   :  { %2423 = vtanh.f32 %v2730_v4 }
 0x78c   :  { %v809_v6 = vpop.permute.xlu1 %808 }
 0x78d   :  { %v2734_v7 = vadd.f32 %v809_v6, %v801_v5 }
 0x78f   :  { %2425 = vtanh.f32 %v2734_v7 }
 0x795   :  { %v2424_v14 = vpop.eup %2423 }
 0x796   :  { %708 = vrot.lane.b32.xlu0 %v2424_v14, %s2515_s12 }
 0x799   :  { %v2426_v15 = vpop.eup %2425 }
 0x79a   :  { %814 = vrot.lane.b32.xlu1 %v2426_v15, %s2515_s12 }
 0x808   :  { %v709_v16 = vpop.permute.xlu0 %708 }
 0x809   :  { %v711_v17 = vmul.f32 %v709_v16, %v694_v58 }
 0x80b   :  { %713 = vrot.lane.b32.xlu0 %v711_v17, %s2514_s2 }
 0x80c   :  { %v815_v18 = vpop.permute.xlu1 %814 }
 0x80d   :  { %v817_v19 = vmul.f32 %v815_v18, %v800_v61  ;;  %v1989_v61 = vld [vmem:[%s2965_s0 + $0x20] sm:$0xff] }
 0x80f   :  { %819 = vrot.lane.b32.xlu1 %v817_v19, %s2514_s2 }
 0x87d   :  { %v714_v20 = vpop.permute.xlu0 %713 }
 0x87e   :  { %1976 = vst.msk [vmem:[%s2969_s4 + $0x10] sm:$0xff] %vm152_vm0, %v714_v20  ;;  %2176 = vmatmul.mubr.msk.f32.vlgmr.msra.gmra.mrb[6].mxu0 %vm152_vm0, %v714_v20 }
 0x87f   :  { %2327 = vmatpush3.bf16.msra.mxu0 %v2579_v9  ;;  %2197 = vmatprep.mubr.msk.f32.mxu0 %vm2513_vm1, %v2511_v8 }
 0x880   :  { %2328 = vmatprep.subr.bf16.mxu0 %v2512_v11 }
 0x881   :  { %v820_v21 = vpop.permute.xlu1 %819 }
 0x882   :  { %1980 = vst.msk [vmem:[%s2970_s5 + $0x28] sm:$0xff] %vm152_vm0, %v820_v21  ;;  %2187 = vmatmul.mubr.msk.f32.vlgmr.msra.gmra.mrb[6].mxu1 %vm152_vm0, %v820_v21 }
 0x883   :  { %2330 = vmatpush3.bf16.msra.mxu0 %v2587_v12  ;;  %2333 = vmatpush3.bf16.msra.mxu1 %v2581_v10 }
 0x884   :  { %2334 = vmatprep.subr.bf16.mxu1 %v2512_v11  ;;  %2208 = vmatprep.mubr.msk.f32.mxu1 %vm2513_vm1, %v2511_v8 }
 0x885   :  { %2337 = vmatprep.subr.bf16.mxu0 %v2512_v11 }
 0x887   :  { %2336 = vmatpush3.bf16.msra.mxu1 %v2589_v13 }
 0x888   :  { %2343 = vmatprep.subr.bf16.mxu1 %v2512_v11 }
 0x951   :  { %v894_v23 = vpop.f32.mrb[6].mxu0 }
 0x952   :  { %v898_v24 = vadd.f32 %v1981_v22, %v894_v23  ;;  %v2177_v25 = vpop.f32.mrb[7].mxu0 }
 0x954   :  { %v1983_v27 = vmul.f32 -1.442695, %v898_v24 }
 0x955   :  { %v1000_v28 = vpop.f32.mrb[6].mxu1 }
 0x956   :  { %2427 = vpow2.f32 %v1983_v27  ;;  %v1004_v29 = vadd.f32 %v1985_v26, %v1000_v28  ;;  %v2188_v30 = vpop.f32.mrb[7].mxu1 }
 0x958   :  { %v1987_v31 = vmul.f32 -1.442695, %v1004_v29 }
 0x95a   :  { %2429 = vpow2.f32 %v1987_v31 }
 0x95b   :  { %2431 = vtanh.f32 %v898_v24 }
 0x960   :  { %v2428_v32 = vpop.eup %2427 }
 0x961   :  { %v903_v33 = vadd.f32 1.0, %v2428_v32 }
 0x963   :  { %2433 = vrcp.f32 %v903_v33 }
 0x964   :  { %v2430_v35 = vpop.eup %2429  ;;  %2435 = vtanh.f32 %v1004_v29 }
 0x965   :  { %v1009_v36 = vadd.f32 1.0, %v2430_v35  ;;  %v2432_v37 = vpop.eup %2431 }
 0x967   :  { %2437 = vrcp.f32 %v1009_v36 }
 0x96d   :  { %v2434_v38 = vpop.eup %2433 }
 0x96e   :  { %v906_v39 = vsel %vm2623_vm4, %v2432_v37, %v2434_v38  ;;  %v2436_v40 = vpop.eup %2435 }
 0x96f   :  { %909 = vrot.lane.b32.xlu0 %v906_v39, %s2515_s12  ;;  %v907_v47 = vmul.f32 %v906_v39, %v2730_v4 }
 0x971   :  { %v2438_v41 = vpop.eup %2437 }
 0x972   :  { %v1012_v42 = vsel %vm2623_vm4, %v2436_v40, %v2438_v41 }
 0x973   :  { %1015 = vrot.lane.b32.xlu1 %v1012_v42, %s2515_s12  ;;  %v1013_v50 = vmul.f32 %v1012_v42, %v2734_v7 }
 0x9e1   :  { %v910_v43 = vpop.permute.xlu0 %909 }
 0x9e2   :  { %v912_v44 = vmul.f32 %v910_v43, %v906_v39 }
 0x9e4   :  { %914 = vrot.lane.b32.xlu0 %v912_v44, %s2514_s2 }
 0x9e5   :  { %v1016_v45 = vpop.permute.xlu1 %1015 }
 0x9e6   :  { %v1018_v46 = vmul.f32 %v1016_v45, %v1012_v42 }
 0x9e8   :  { %1020 = vrot.lane.b32.xlu1 %v1018_v46, %s2514_s2  ;;  %v2001_v46 = vld [vmem:[%s2966_s1 + $0x10] sm:$0xff] }
 0xa56   :  { %v915_v48 = vpop.permute.xlu0 %914 }
 0xa57   :  { %v2778_v49 = vadd.f32 %v915_v48, %v907_v47 }
 0xa59   :  { %2439 = vtanh.f32 %v2778_v49 }
 0xa5a   :  { %v1021_v51 = vpop.permute.xlu1 %1020 }
 0xa5b   :  { %v2782_v52 = vadd.f32 %v1021_v51, %v1013_v50 }
 0xa5d   :  { %2441 = vtanh.f32 %v2782_v52 }
 0xa63   :  { %v2440_v53 = vpop.eup %2439 }
 0xa64   :  { %920 = vrot.lane.b32.xlu0 %v2440_v53, %s2515_s12 }
 0xa67   :  { %v2442_v54 = vpop.eup %2441 }
 0xa68   :  { %1026 = vrot.lane.b32.xlu1 %v2442_v54, %s2515_s12 }
 0xad6   :  { %v921_v55 = vpop.permute.xlu0 %920 }
 0xad7   :  { %v923_v56 = vmul.f32 %v921_v55, %v906_v39 }
 0xad9   :  { %925 = vrot.lane.b32.xlu0 %v923_v56, %s2514_s2 }
 0xada   :  { %v1027_v57 = vpop.permute.xlu1 %1026 }
 0xadb   :  { %v1029_v58 = vmul.f32 %v1027_v57, %v1012_v42  ;;  %v1997_v42 = vld [vmem:[%s2965_s0 + $0x28] sm:$0xff] }
 0xadd   :  { %1031 = vrot.lane.b32.xlu1 %v1029_v58, %s2514_s2 }
 0xb4b   :  { %v926_v59 = vpop.permute.xlu0 %925 }
 0xb4c   :  { %1984 = vst.msk [vmem:[%s2969_s4 + $0x18] sm:$0xff] %vm152_vm0, %v926_v59  ;;  %2198 = vmatmul.mubr.msk.f32.vlgmr.msra.gmra.mrb[8].mxu0 %vm152_vm0, %v926_v59 }
 0xb4d   :  { %2339 = vmatpush3.bf16.msra.mxu0 %v2579_v9  ;;  %2219 = vmatprep.mubr.msk.f32.mxu0 %vm2513_vm1, %v2511_v8 }
 0xb4e   :  { %2340 = vmatprep.subr.bf16.mxu0 %v2512_v11 }
 0xb4f   :  { %v1032_v60 = vpop.permute.xlu1 %1031 }
 0xb50   :  { %1988 = vst.msk [vmem:[%s2970_s5 + $0x20] sm:$0xff] %vm152_vm0, %v1032_v60  ;;  %2209 = vmatmul.mubr.msk.f32.vlgmr.msra.gmra.mrb[8].mxu1 %vm152_vm0, %v1032_v60 }
 0xb51   :  { %2342 = vmatpush3.bf16.msra.mxu0 %v2587_v12  ;;  %2345 = vmatpush3.bf16.msra.mxu1 %v2581_v10 }
 0xb52   :  { %2346 = vmatprep.subr.bf16.mxu1 %v2512_v11  ;;  %2230 = vmatprep.mubr.msk.f32.mxu1 %vm2513_vm1, %v2511_v8 }
 0xb53   :  { %2349 = vmatprep.subr.bf16.mxu0 %v2512_v11 }
 0xb55   :  { %2348 = vmatpush3.bf16.msra.mxu1 %v2589_v13 }
 0xb56   :  { %2355 = vmatprep.subr.bf16.mxu1 %v2512_v11 }
 0xc1f   :  { %v1106_v62 = vpop.f32.mrb[8].mxu0 }
 0xc20   :  { %v1110_v63 = vadd.f32 %v1989_v61, %v1106_v62  ;;  %v2199_v0 = vpop.f32.mrb[9].mxu0 }
 0xc22   :  { %v1991_v2 = vmul.f32 -1.442695, %v1110_v63 }
 0xc23   :  { %v1212_v3 = vpop.f32.mrb[8].mxu1 }
 0xc24   :  { %2443 = vpow2.f32 %v1991_v2  ;;  %v1216_v4 = vadd.f32 %v1993_v1, %v1212_v3  ;;  %v2210_v5 = vpop.f32.mrb[9].mxu1 }
 0xc26   :  { %v1995_v6 = vmul.f32 -1.442695, %v1216_v4 }
 0xc28   :  { %2445 = vpow2.f32 %v1995_v6 }
 0xc29   :  { %2447 = vtanh.f32 %v1110_v63 }
 0xc2e   :  { %v2444_v7 = vpop.eup %2443 }
 0xc2f   :  { %v1115_v14 = vadd.f32 1.0, %v2444_v7 }
 0xc31   :  { %2449 = vrcp.f32 %v1115_v14 }
 0xc32   :  { %v2446_v15 = vpop.eup %2445  ;;  %2451 = vtanh.f32 %v1216_v4 }
 0xc33   :  { %v1221_v16 = vadd.f32 1.0, %v2446_v15  ;;  %v2448_v17 = vpop.eup %2447 }
 0xc35   :  { %2453 = vrcp.f32 %v1221_v16 }
 0xc3b   :  { %v2450_v18 = vpop.eup %2449 }
 0xc3c   :  { %v1118_v19 = vsel %vm2623_vm4, %v2448_v17, %v2450_v18  ;;  %v2452_v20 = vpop.eup %2451 }
 0xc3d   :  { %1121 = vrot.lane.b32.xlu0 %v1118_v19, %s2515_s12  ;;  %v1119_v27 = vmul.f32 %v1118_v19, %v2778_v49 }
 0xc3f   :  { %v2454_v21 = vpop.eup %2453 }
 0xc40   :  { %v1224_v22 = vsel %vm2623_vm4, %v2452_v20, %v2454_v21 }
 0xc41   :  { %1227 = vrot.lane.b32.xlu1 %v1224_v22, %s2515_s12  ;;  %v1225_v30 = vmul.f32 %v1224_v22, %v2782_v52 }
 0xcaf   :  { %v1122_v23 = vpop.permute.xlu0 %1121 }
 0xcb0   :  { %v1124_v24 = vmul.f32 %v1122_v23, %v1118_v19 }
 0xcb2   :  { %1126 = vrot.lane.b32.xlu0 %v1124_v24, %s2514_s2 }
 0xcb3   :  { %v1228_v25 = vpop.permute.xlu1 %1227 }
 0xcb4   :  { %v1230_v26 = vmul.f32 %v1228_v25, %v1224_v22 }
 0xcb6   :  { %1232 = vrot.lane.b32.xlu1 %v1230_v26, %s2514_s2 }
 0xd24   :  { %v1127_v28 = vpop.permute.xlu0 %1126 }
 0xd25   :  { %v2826_v29 = vadd.f32 %v1127_v28, %v1119_v27 }
 0xd27   :  { %2455 = vtanh.f32 %v2826_v29 }
 0xd28   :  { %v1233_v31 = vpop.permute.xlu1 %1232 }
 0xd29   :  { %v2830_v32 = vadd.f32 %v1233_v31, %v1225_v30 }
 0xd2b   :  { %2457 = vtanh.f32 %v2830_v32 }
 0xd31   :  { %v2456_v33 = vpop.eup %2455 }
 0xd32   :  { %1132 = vrot.lane.b32.xlu0 %v2456_v33, %s2515_s12 }
 0xd35   :  { %v2458_v35 = vpop.eup %2457 }
 0xd36   :  { %1238 = vrot.lane.b32.xlu1 %v2458_v35, %s2515_s12 }
 0xda4   :  { %v1133_v36 = vpop.permute.xlu0 %1132 }
 0xda5   :  { %v1135_v37 = vmul.f32 %v1133_v36, %v1118_v19 }
 0xda7   :  { %1137 = vrot.lane.b32.xlu0 %v1135_v37, %s2514_s2 }
 0xda8   :  { %v1239_v38 = vpop.permute.xlu1 %1238 }
 0xda9   :  { %v1241_v39 = vmul.f32 %v1239_v38, %v1224_v22 }
 0xdab   :  { %1243 = vrot.lane.b32.xlu1 %v1241_v39, %s2514_s2 }
 0xe19   :  { %v1138_v40 = vpop.permute.xlu0 %1137 }
 0xe1a   :  { %1992 = vst.msk [vmem:[%s2969_s4 + $0x20] sm:$0xff] %vm152_vm0, %v1138_v40  ;;  %2220 = vmatmul.mubr.msk.f32.vlgmr.msra.gmra.mrb[10].mxu0 %vm152_vm0, %v1138_v40 }
 0xe1b   :  { %2351 = vmatpush3.bf16.msra.mxu0 %v2579_v9  ;;  %2241 = vmatprep.mubr.msk.f32.mxu0 %vm2513_vm1, %v2511_v8 }
 0xe1c   :  { %2352 = vmatprep.subr.bf16.mxu0 %v2512_v11 }
 0xe1d   :  { %v1244_v41 = vpop.permute.xlu1 %1243 }
 0xe1e   :  { %1996 = vst.msk [vmem:[%s2970_s5 + $0x18] sm:$0xff] %vm152_vm0, %v1244_v41  ;;  %2231 = vmatmul.mubr.msk.f32.vlgmr.msra.gmra.mrb[10].mxu1 %vm152_vm0, %v1244_v41 }
 0xe1f   :  { %2354 = vmatpush3.bf16.msra.mxu0 %v2587_v12  ;;  %2357 = vmatpush3.bf16.msra.mxu1 %v2581_v10 }
 0xe20   :  { %2358 = vmatprep.subr.bf16.mxu1 %v2512_v11  ;;  %2252 = vmatprep.mubr.msk.f32.mxu1 %vm2513_vm1, %v2511_v8 }
 0xe21   :  { %2361 = vmatprep.subr.bf16.mxu0 %v2512_v11 }
 0xe23   :  { %2360 = vmatpush3.bf16.msra.mxu1 %v2589_v13 }
 0xe24   :  { %2367 = vmatprep.subr.bf16.mxu1 %v2512_v11 }
 0xeed   :  { %v1318_v43 = vpop.f32.mrb[10].mxu0 }
 0xeee   :  { %v1322_v44 = vadd.f32 %v1997_v42, %v1318_v43  ;;  %v2221_v45 = vpop.f32.mrb[11].mxu0 }
 0xef0   :  { %v1999_v47 = vmul.f32 -1.442695, %v1322_v44 }
 0xef1   :  { %v1424_v48 = vpop.f32.mrb[10].mxu1 }
 0xef2   :  { %2459 = vpow2.f32 %v1999_v47  ;;  %v1428_v49 = vadd.f32 %v2001_v46, %v1424_v48  ;;  %v2232_v50 = vpop.f32.mrb[11].mxu1 }
 0xef4   :  { %v2003_v51 = vmul.f32 -1.442695, %v1428_v49 }
 0xef6   :  { %2461 = vpow2.f32 %v2003_v51 }
 0xef7   :  { %2463 = vtanh.f32 %v1322_v44 }
 0xefc   :  { %v2460_v52 = vpop.eup %2459 }
 0xefd   :  { %v1327_v53 = vadd.f32 1.0, %v2460_v52 }
 0xeff   :  { %2465 = vrcp.f32 %v1327_v53 }
 0xf00   :  { %v2462_v54 = vpop.eup %2461  ;;  %2467 = vtanh.f32 %v1428_v49 }
 0xf01   :  { %v1433_v55 = vadd.f32 1.0, %v2462_v54  ;;  %v2464_v56 = vpop.eup %2463 }
 0xf03   :  { %2469 = vrcp.f32 %v1433_v55  ;;  %v2013_v55 = vld [vmem:[%s2965_s0 + $0x38] sm:$0xff] }
 0xf09   :  { %v2466_v57 = vpop.eup %2465 }
 0xf0a   :  { %v1330_v58 = vsel %vm2623_vm4, %v2464_v56, %v2466_v57  ;;  %v2468_v59 = vpop.eup %2467 }
 0xf0b   :  { %1333 = vrot.lane.b32.xlu0 %v1330_v58, %s2515_s12  ;;  %v1331_v2 = vmul.f32 %v1330_v58, %v2826_v29 }
 0xf0d   :  { %v2470_v60 = vpop.eup %2469 }
 0xf0e   :  { %v1436_v61 = vsel %vm2623_vm4, %v2468_v59, %v2470_v60  ;;  %v1778_v59 = vld [vmem:[%s2966_s1] sm:$0xff] }
 0xf0f   :  { %1439 = vrot.lane.b32.xlu1 %v1436_v61, %s2515_s12  ;;  %v1437_v5 = vmul.f32 %v1436_v61, %v2830_v32 }
 0xf7d   :  { %v1334_v62 = vpop.permute.xlu0 %1333 }
 0xf7e   :  { %v1336_v63 = vmul.f32 %v1334_v62, %v1330_v58 }
 0xf80   :  { %1338 = vrot.lane.b32.xlu0 %v1336_v63, %s2514_s2 }
 0xf81   :  { %v1440_v0 = vpop.permute.xlu1 %1439 }
 0xf82   :  { %v1442_v1 = vmul.f32 %v1440_v0, %v1436_v61 }
 0xf84   :  { %1444 = vrot.lane.b32.xlu1 %v1442_v1, %s2514_s2 }
 0xff2   :  { %v1339_v3 = vpop.permute.xlu0 %1338 }
 0xff3   :  { %v2874_v4 = vadd.f32 %v1339_v3, %v1331_v2 }
 0xff5   :  { %2471 = vtanh.f32 %v2874_v4 }
 0xff6   :  { %v1445_v6 = vpop.permute.xlu1 %1444 }
 0xff7   :  { %v2878_v7 = vadd.f32 %v1445_v6, %v1437_v5 }
 0xff9   :  { %2473 = vtanh.f32 %v2878_v7 }
 0xfff   :  { %v2472_v14 = vpop.eup %2471 }
0x1000   :  { %1344 = vrot.lane.b32.xlu0 %v2472_v14, %s2515_s12 }
0x1003   :  { %v2474_v15 = vpop.eup %2473 }
0x1004   :  { %1450 = vrot.lane.b32.xlu1 %v2474_v15, %s2515_s12 }
0x1072   :  { %v1345_v16 = vpop.permute.xlu0 %1344 }
0x1073   :  { %v1347_v17 = vmul.f32 %v1345_v16, %v1330_v58 }
0x1075   :  { %1349 = vrot.lane.b32.xlu0 %v1347_v17, %s2514_s2 }
0x1076   :  { %v1451_v18 = vpop.permute.xlu1 %1450 }
0x1077   :  { %v1453_v19 = vmul.f32 %v1451_v18, %v1436_v61 }
0x1079   :  { %1455 = vrot.lane.b32.xlu1 %v1453_v19, %s2514_s2 }
0x10e7   :  { %v1350_v20 = vpop.permute.xlu0 %1349 }
0x10e8   :  { %2000 = vst.msk [vmem:[%s2969_s4 + $0x28] sm:$0xff] %vm152_vm0, %v1350_v20  ;;  %2242 = vmatmul.mubr.msk.f32.vlgmr.msra.gmra.mrb[12].mxu0 %vm152_vm0, %v1350_v20 }
0x10e9   :  { %2363 = vmatpush3.bf16.msra.mxu0 %v2579_v9  ;;  %2263 = vmatprep.mubr.msk.f32.mxu0 %vm2513_vm1, %v2511_v8  ;;  %v2005_v9 = vld [vmem:[%s2965_s0 + $0x30] sm:$0xff]  ;;  %s2516_s0 = smov 96  }
0x10ea   :  { %2364 = vmatprep.subr.bf16.mxu0 %v2512_v11 }
0x10eb   :  { %v1456_v21 = vpop.permute.xlu1 %1455 }
0x10ec   :  { %2004 = vst.msk [vmem:[%s2970_s5 + $0x10] sm:$0xff] %vm152_vm0, %v1456_v21  ;;  %2253 = vmatmul.mubr.msk.f32.vlgmr.msra.gmra.mrb[12].mxu1 %vm152_vm0, %v1456_v21 }
0x10ed   :  { %2366 = vmatpush3.bf16.msra.mxu0 %v2587_v12  ;;  %2369 = vmatpush3.bf16.msra.mxu1 %v2581_v10  ;;  %v2009_v12 = vld [vmem:[%s2966_s1 + $0x8] sm:$0xff] }
0x10ee   :  { %2370 = vmatprep.subr.bf16.mxu1 %v2512_v11  ;;  %2274 = vmatprep.mubr.msk.f32.mxu1 %vm2513_vm1, %v2511_v8 }
0x10f1   :  { %2372 = vmatpush3.bf16.msra.mxu1 %v2589_v13 }
0x11bb   :  { %v1530_v22 = vpop.f32.mrb[12].mxu0 }
0x11bc   :  { %v1534_v23 = vadd.f32 %v2005_v9, %v1530_v22  ;;  %v2243_v24 = vpop.f32.mrb[13].mxu0 }
0x11be   :  { %v2007_v25 = vmul.f32 -1.442695, %v1534_v23 }
0x11bf   :  { %v1636_v10 = vpop.f32.mrb[12].mxu1 }
0x11c0   :  { %2475 = vpow2.f32 %v2007_v25  ;;  %v1640_v11 = vadd.f32 %v2009_v12, %v1636_v10  ;;  %v2254_v26 = vpop.f32.mrb[13].mxu1 }
0x11c2   :  { %v2011_v27 = vmul.f32 -1.442695, %v1640_v11 }
0x11c4   :  { %2477 = vpow2.f32 %v2011_v27 }
0x11c5   :  { %2479 = vtanh.f32 %v1534_v23 }
0x11ca   :  { %v2476_v8 = vpop.eup %2475 }
0x11cb   :  { %v1539_v13 = vadd.f32 1.0, %v2476_v8 }
0x11cd   :  { %2481 = vrcp.f32 %v1539_v13 }
0x11ce   :  { %v2478_v28 = vpop.eup %2477  ;;  %2483 = vtanh.f32 %v1640_v11 }
0x11cf   :  { %v1645_v29 = vadd.f32 1.0, %v2478_v28  ;;  %v2480_v30 = vpop.eup %2479 }
0x11d1   :  { %2485 = vrcp.f32 %v1645_v29 }
0x11d7   :  { %v2482_v31 = vpop.eup %2481 }
0x11d8   :  { %v1542_v32 = vsel %vm2623_vm4, %v2480_v30, %v2482_v31  ;;  %v2484_v33 = vpop.eup %2483 }
0x11d9   :  { %1545 = vrot.lane.b32.xlu0 %v1542_v32, %s2515_s12  ;;  %v1543_v41 = vmul.f32 %v1542_v32, %v2874_v4 }
0x11db   :  { %v2486_v35 = vpop.eup %2485 }
0x11dc   :  { %v1648_v36 = vsel %vm2623_vm4, %v2484_v33, %v2486_v35 }
0x11dd   :  { %1651 = vrot.lane.b32.xlu1 %v1648_v36, %s2515_s12  ;;  %v1649_v44 = vmul.f32 %v1648_v36, %v2878_v7 }
0x124b   :  { %v1546_v37 = vpop.permute.xlu0 %1545 }
0x124c   :  { %v1548_v38 = vmul.f32 %v1546_v37, %v1542_v32 }
0x124e   :  { %1550 = vrot.lane.b32.xlu0 %v1548_v38, %s2514_s2 }
0x124f   :  { %v1652_v39 = vpop.permute.xlu1 %1651 }
0x1250   :  { %v1654_v40 = vmul.f32 %v1652_v39, %v1648_v36 }
0x1252   :  { %1656 = vrot.lane.b32.xlu1 %v1654_v40, %s2514_s2 }
0x12c0   :  { %v1551_v42 = vpop.permute.xlu0 %1550 }
0x12c1   :  { %v1553_v43 = vadd.f32 %v1551_v42, %v1543_v41 }
0x12c3   :  { %2487 = vtanh.f32 %v1553_v43 }
0x12c4   :  { %v1657_v45 = vpop.permute.xlu1 %1656 }
0x12c5   :  { %v1659_v46 = vadd.f32 %v1657_v45, %v1649_v44 }
0x12c7   :  { %2489 = vtanh.f32 %v1659_v46 }
0x12cd   :  { %v2488_v47 = vpop.eup %2487 }
0x12ce   :  { %1556 = vrot.lane.b32.xlu0 %v2488_v47, %s2515_s12 }
0x12d1   :  { %v2490_v48 = vpop.eup %2489 }
0x12d2   :  { %1662 = vrot.lane.b32.xlu1 %v2490_v48, %s2515_s12 }
0x1340   :  { %v1557_v49 = vpop.permute.xlu0 %1556 }
0x1341   :  { %v1559_v50 = vmul.f32 %v1557_v49, %v1542_v32 }
0x1343   :  { %1561 = vrot.lane.b32.xlu0 %v1559_v50, %s2514_s2 }
0x1344   :  { %v1663_v51 = vpop.permute.xlu1 %1662 }
0x1345   :  { %v1665_v52 = vmul.f32 %v1663_v51, %v1648_v36 }
0x1347   :  { %1667 = vrot.lane.b32.xlu1 %v1665_v52, %s2514_s2 }
0x13b5   :  { %v1562_v53 = vpop.permute.xlu0 %1561 }
0x13b6   :  { %2008 = vst.msk [vmem:[%s2969_s4 + $0x30] sm:$0xff] %vm152_vm0, %v1562_v53  ;;  %2264 = vmatmul.mubr.msk.f32.vlgmr.msra.gmra.mrb[14].mxu0 %vm152_vm0, %v1562_v53 }
0x13b9   :  { %v1668_v54 = vpop.permute.xlu1 %1667 }
0x13ba   :  { %2012 = vst.msk [vmem:[%s2970_s5 + $0x8] sm:$0xff] %vm152_vm0, %v1668_v54  ;;  %2275 = vmatmul.mubr.msk.f32.vlgmr.msra.gmra.mrb[14].mxu1 %vm152_vm0, %v1668_v54 }
0x1489   :  { %v1742_v56 = vpop.f32.mrb[14].mxu0 }
0x148a   :  { %v1746_v57 = vadd.f32 %v2013_v55, %v1742_v56  ;;  %v2265_v58 = vpop.f32.mrb[15].mxu0 }
0x148c   :  { %v2015_v60 = vmul.f32 -1.442695, %v1746_v57 }
0x148d   :  { %v1847_v61 = vpop.f32.mrb[14].mxu1 }
0x148e   :  { %2491 = vpow2.f32 %v2015_v60  ;;  %v1851_v62 = vadd.f32 %v1847_v61, %v1778_v59  ;;  %v2276_v63 = vpop.f32.mrb[15].mxu1 }
0x1490   :  { %v2018_v0 = vmul.f32 -1.442695, %v1851_v62 }
0x1492   :  { %2493 = vpow2.f32 %v2018_v0 }
0x1493   :  { %2495 = vtanh.f32 %v1746_v57 }
0x1498   :  { %v2492_v1 = vpop.eup %2491 }
0x1499   :  { %v1751_v2 = vadd.f32 1.0, %v2492_v1 }
0x149b   :  { %2497 = vrcp.f32 %v1751_v2 }
0x149c   :  { %v2494_v3 = vpop.eup %2493  ;;  %2499 = vtanh.f32 %v1851_v62 }
0x149d   :  { %v1856_v4 = vadd.f32 1.0, %v2494_v3  ;;  %v2496_v5 = vpop.eup %2495 }
0x149f   :  { %2501 = vrcp.f32 %v1856_v4 }
0x14a5   :  { %v2498_v6 = vpop.eup %2497 }
0x14a6   :  { %v1754_v7 = vsel %vm2623_vm4, %v2496_v5, %v2498_v6  ;;  %v2500_v14 = vpop.eup %2499 }
0x14a7   :  { %1757 = vrot.lane.b32.xlu0 %v1754_v7, %s2515_s12  ;;  %v1755_v21 = vmul.f32 %v1754_v7, %v1553_v43 }
0x14a9   :  { %v2502_v15 = vpop.eup %2501 }
0x14aa   :  { %v1859_v16 = vsel %vm2623_vm4, %v2500_v14, %v2502_v15 }
0x14ab   :  { %1862 = vrot.lane.b32.xlu1 %v1859_v16, %s2515_s12  ;;  %v1860_v23 = vmul.f32 %v1859_v16, %v1659_v46 }
0x1519   :  { %v1758_v17 = vpop.permute.xlu0 %1757 }
0x151a   :  { %v1760_v18 = vmul.f32 %v1758_v17, %v1754_v7 }
0x151c   :  { %1762 = vrot.lane.b32.xlu0 %v1760_v18, %s2514_s2 }
0x151d   :  { %v1863_v19 = vpop.permute.xlu1 %1862 }
0x151e   :  { %v1865_v20 = vmul.f32 %v1863_v19, %v1859_v16 }
0x1520   :  { %1867 = vrot.lane.b32.xlu1 %v1865_v20, %s2514_s2 }
0x158e   :  { %v1763_v9 = vpop.permute.xlu0 %1762 }
0x158f   :  { %v1765_v22 = vadd.f32 %v1763_v9, %v1755_v21 }
0x1591   :  { %2503 = vtanh.f32 %v1765_v22 }
0x1592   :  { %v1868_v24 = vpop.permute.xlu1 %1867 }
0x1593   :  { %v1870_v12 = vadd.f32 %v1868_v24, %v1860_v23 }
0x1595   :  { %2505 = vtanh.f32 %v1870_v12 }
0x159b   :  { %v2504_v34 = vpop.eup %2503 }
0x159c   :  { %1768 = vrot.lane.b32.xlu0 %v2504_v34, %s2515_s12 }
0x159f   :  { %v2506_v25 = vpop.eup %2505 }
0x15a0   :  { %1873 = vrot.lane.b32.xlu1 %v2506_v25, %s2515_s12 }
0x160e   :  { %v1769_v10 = vpop.permute.xlu0 %1768 }
0x160f   :  { %v1771_v11 = vmul.f32 %v1769_v10, %v1754_v7 }
0x1611   :  { %1773 = vrot.lane.b32.xlu0 %v1771_v11, %s2514_s2 }
0x1612   :  { %v1874_v26 = vpop.permute.xlu1 %1873 }
0x1613   :  { %v1876_v27 = vmul.f32 %v1874_v26, %v1859_v16 }
0x1615   :  { %1878 = vrot.lane.b32.xlu1 %v1876_v27, %s2514_s2  ;;  %1884 = vrot.lane.b32.xlu0 %v1765_v22, %s2516_s0 }
0x1619   :  { %1890 = vrot.lane.b32.xlu1 %v1870_v12, %s2516_s0 }
0x1683   :  { %v1774_v8 = vpop.permute.xlu0 %1773 }
0x1684   :  { %2016 = vst.msk [vmem:[%s2969_s4 + $0x38] sm:$0xff] %vm152_vm0, %v1774_v8  ;;  %1882 = vst.msk [vmem:[#allocation2] sm:$0xff] %vm152_vm0, %v1774_v8 }
0x1687   :  { %v1879_v13 = vpop.permute.xlu1 %1878  ;;  %v1885_v28 = vpop.permute.xlu0 %1884 }
0x1688   :  { %1881 = vst.msk [vmem:[%s2970_s5] sm:$0xff] %vm152_vm0, %v1879_v13  ;;  %1888 = vst.msk [vmem:[#allocation4] sm:$0xff] %vm152_vm0, %v1879_v13 }
0x1689   :  { %1887 = vst.msk [vmem:[#allocation3] sm:$0xff] %vm152_vm0, %v1885_v28 }
0x168b   :  { %v1891_v29 = vpop.permute.xlu1 %1890 }
0x168c   :  { %1893 = vst.msk [vmem:[#allocation5] sm:$0xff] %vm152_vm0, %v1891_v29 }
0x168d   :  { %1916 = vsyncmov [#allocation8] }
0x1690   :  { %s1917_s2 = vpop.sfrf %1916 }
0x1691   :  { %p2019_p0 = scmp.ne.s32.totalorder %s1917_s2, 0 }
0x1693   :  { %1921 = shalt.err (%p2019_p0)  }
0x1694   :  { %1923 = vsyncmov [#allocation8 + $0x1] }
0x1697   :  { %s1924_s4 = vpop.sfrf %1923 }
0x1698   :  { %p2020_p1 = scmp.ne.s32.totalorder %s1924_s4, 0 }
0x169a   :  { %1928 = shalt.err (%p2020_p1)  }

</bundles_post_ra>
